<compile_context>
chip_gen: v6e
topology: v6e:2x2x1
jax: 0.10.0
libtpu: 0.0.40
codegen_flags: <defaults>
</compile_context>

<pallas_src>
import functools

import jax
import jax.numpy as jnp
from jax.experimental import pallas as pl
from jax.experimental.pallas import tpu as pltpu


def moe_kernel(x_ref, wg_ref, bg_ref, w1c_ref, b1c_ref, w2c_ref, b2s_ref,
               gsel_ref, o_ref, *, eps, compute_dtype, approx_recip):
    x = x_ref[...].astype(jnp.float32)                             # (TB, D)

    # ---- LayerNorm statistics (two-pass variance; affine folded into gate) --
    mean = jnp.mean(x, axis=-1, keepdims=True)
    centered = x - mean
    var = jnp.mean(centered * centered, axis=-1, keepdims=True)
    xn = centered * jax.lax.rsqrt(var + eps)                       # (TB, D)

    # ---- gate logits + softmax over experts ----
    # logits = (xn*gamma + beta) @ wg + bg  ==  xn @ wg' + bg'  (folded host-side)
    logits = jnp.dot(xn.astype(compute_dtype), wg_ref[...],
                     preferred_element_type=jnp.float32) + bg_ref[...]     # (TB, E)
    m = jnp.max(logits, axis=-1, keepdims=True)
    p = jnp.exp(logits - m)
    denom = jnp.sum(p, axis=-1, keepdims=True)
    if approx_recip:
        gate_w = p * pl.reciprocal(denom, approx=True)             # EUP slot
    else:
        gate_w = p / denom
    # gate_w: (TB, E), f32

    # ---- experts stage 1: one fused (TB, D) @ (D, E*H) MXU matmul ----
    h = jnp.dot(x.astype(compute_dtype), w1c_ref[...],
                preferred_element_type=jnp.float32) + b1c_ref[...]         # (TB, E*H)
    h = jnp.maximum(h, 0.0)
    # TODO(synk): Dropout(0.1) omitted (inference semantics); training parity
    # would need pltpu.prng_seed / pltpu.prng_random_bits here.

    # ---- fold the gate into one second matmul ----
    # gate broadcast over each expert's H columns via a (E, E*H) 0/1 matrix
    # (exact in bf16: one nonzero per column).
    gate_rep = jnp.dot(gate_w.astype(compute_dtype), gsel_ref[...],
                       preferred_element_type=jnp.float32)                 # (TB, E*H)
    out = jnp.dot((gate_rep * h).astype(compute_dtype), w2c_ref[...],
                  preferred_element_type=jnp.float32)                      # (TB, out)
    # expert output biases collapse into a tiny (TB, E) @ (E, out) dot
    out = out + jnp.dot(gate_w.astype(compute_dtype), b2s_ref[...],
                        preferred_element_type=jnp.float32)
    o_ref[...] = out.astype(o_ref.dtype)


def moe_forward(x, params, *, num_experts, eps=1e-5, tb=None, precise=False):
    B, D = x.shape
    E = num_experts
    H = params["w1"].shape[-1]
    out_dim = params["w2"].shape[-1]

    # Single grid step for small batches; cap tile at 256 rows for large B.
    if tb is None:
        tb = B if B <= 256 else 256
    tb = min(tb, B)
    assert B % tb == 0, "batch must be divisible by the batch tile"
    grid_steps = B // tb

    compute_dtype = jnp.float32 if precise else jnp.bfloat16

    # ---- host-side parameter fusion ----
    gamma = params["gamma"].reshape(-1)                    # (D,)
    beta = params["beta"].reshape(1, -1)                   # (1, D)
    # Fold LayerNorm affine into the gate weights.
    wg_f = (gamma[:, None] * params["wg"]).astype(compute_dtype)           # (D, E)
    bg_f = (params["bg"] + beta @ params["wg"]).astype(jnp.float32)        # (1, E)
    # Stacked expert parameters, lane-aligned E*H axis.
    w1c = jnp.transpose(params["w1"], (1, 0, 2)).reshape(D, E * H).astype(compute_dtype)
    b1c = params["b1"].reshape(1, E * H).astype(jnp.float32)
    w2c = params["w2"].reshape(E * H, out_dim).astype(compute_dtype)
    b2s = params["b2"].reshape(E, out_dim).astype(compute_dtype)
    gsel = jnp.repeat(jnp.eye(E, dtype=compute_dtype), H, axis=1)          # (E, E*H)

    kernel = functools.partial(moe_kernel, eps=eps, compute_dtype=compute_dtype,
                               approx_recip=not precise)

    # Weights stay fully VMEM-resident and single-buffered across grid steps.
    resident = pl.BlockSpec(memory_space=pltpu.MemorySpace.VMEM)

    # Only shard the batch axis across cores (megacore) when there are
    # multiple steps AND the per-core tile is big enough to amortize the
    # duplicated resident-weight DMA (v7x: 2 TCs/chip).
    semantics = ("parallel",) if (grid_steps > 1 and tb >= 128) else ("arbitrary",)

    return pl.pallas_call(
        kernel,
        out_shape=jax.ShapeDtypeStruct((B, out_dim), x.dtype),
        grid=(grid_steps,),
        in_specs=[
            pl.BlockSpec((tb, D), lambda i: (i, 0)),    # x: tiled over batch
            resident,   # wg folded   (D, E)
            resident,   # bg folded   (1, E)
            resident,   # w1 stacked  (D, E*H)
            resident,   # b1 stacked  (1, E*H)
            resident,   # w2 stacked  (E*H, out)
            resident,   # b2 stacked  (E, out)
            resident,   # gate expansion (E, E*H)
        ],
        out_specs=pl.BlockSpec((tb, out_dim), lambda i: (i, 0)),
        compiler_params=pltpu.CompilerParams(
            dimension_semantics=semantics,
            vmem_limit_bytes=8 * 1024 * 1024),
    )(x, wg_f, bg_f, w1c, b1c, w2c, b2s, gsel)


def make_params(key, input_dim, hidden_dim, num_experts, out_dim):
    ks = jax.random.split(key, 6)
    s1 = 1.0 / jnp.sqrt(input_dim)
    s2 = 1.0 / jnp.sqrt(hidden_dim)
    return {
        "gamma": jnp.ones((1, input_dim), jnp.float32),
        "beta": jnp.zeros((1, input_dim), jnp.float32),
        "wg": jax.random.uniform(ks[0], (input_dim, num_experts), jnp.float32, -s1, s1),
        "bg": jax.random.uniform(ks[1], (1, num_experts), jnp.float32, -s1, s1),
        "w1": jax.random.uniform(ks[2], (num_experts, input_dim, hidden_dim), jnp.float32, -s1, s1),
        "b1": jax.random.uniform(ks[3], (num_experts, 1, hidden_dim), jnp.float32, -s1, s1),
        "w2": jax.random.uniform(ks[4], (num_experts, hidden_dim, out_dim), jnp.float32, -s2, s2),
        "b2": jax.random.uniform(ks[5], (num_experts, 1, out_dim), jnp.float32, -s2, s2),
    }


def moe_reference(x, params, *, num_experts, eps=1e-5):
    mean = jnp.mean(x, axis=-1, keepdims=True)
    var = jnp.mean((x - mean) ** 2, axis=-1, keepdims=True)
    xn = (x - mean) / jnp.sqrt(var + eps)
    gate_in = xn * params["gamma"] + params["beta"]
    logits = gate_in @ params["wg"] + params["bg"]
    w = jax.nn.softmax(logits, axis=-1)
    out = jnp.zeros((x.shape[0], params["w2"].shape[-1]), x.dtype)
    for e in range(num_experts):
        h = jnp.maximum(x @ params["w1"][e] + params["b1"][e], 0.0)
        y = h @ params["w2"][e] + params["b2"][e]
        out = out + y * w[:, e:e + 1]
    return out


if __name__ == "__main__":
    # MoE shapes implied by MalwareClassifier defaults (d_model=128):
    #   input_dim = 2*d_model = 256, expert_hidden_dim = 256,
    #   num_experts = 4, output_dim = d_model = 128.
    B, input_dim, hidden_dim, num_experts, out_dim = 16, 256, 256, 4, 128

    key = jax.random.PRNGKey(0)
    kx, kp = jax.random.split(key)
    x = jax.random.normal(kx, (B, input_dim), jnp.float32)
    params = make_params(kp, input_dim, hidden_dim, num_experts, out_dim)

    ref = moe_reference(x, params, num_experts=num_experts)

    # Fast path: bf16 MXU operands + approx EUP reciprocal.
    out_fast = jax.block_until_ready(moe_forward(x, params, num_experts=num_experts))
    assert jnp.allclose(out_fast, ref, rtol=2e-2, atol=2e-2), "fast-path mismatch"

    # Precise path: f32 operands + exact reciprocal -> tight tolerance so any
    # logic error is not hidden behind bf16 / approx-reciprocal noise.
    out_precise = jax.block_until_ready(
        moe_forward(x, params, num_experts=num_experts, precise=True))
    assert jnp.allclose(out_precise, ref, rtol=5e-4, atol=5e-4), "precise-path mismatch"

    print("KERNEL_OK")
</pallas_src>

<mosaic_0001>
module attributes {stable_mosaic.version = 11 : i64} {
  func.func @moe_kernel(%arg0: i32, %arg1: memref<16x256xf32, #tpu.memory_space<vmem>>, %arg2: memref<256x4xbf16, #tpu.memory_space<vmem>>, %arg3: memref<1x4xf32, #tpu.memory_space<vmem>>, %arg4: memref<256x1024xbf16, #tpu.memory_space<vmem>>, %arg5: memref<1x1024xf32, #tpu.memory_space<vmem>>, %arg6: memref<1024x128xbf16, #tpu.memory_space<vmem>>, %arg7: memref<4x128xbf16, #tpu.memory_space<vmem>>, %arg8: memref<4x1024xbf16, #tpu.memory_space<vmem>>, %arg9: memref<16x128xf32, #tpu.memory_space<vmem>>) attributes {dimension_semantics = [#tpu.dimension_semantics<arbitrary>], iteration_bounds = array<i64: 1>, scalar_prefetch = 0 : i64, scratch_operands = 0 : i64, tpu.core_type = #tpu.core_type<tc>, window_params = [{transform_indices = @transform_0, window_bounds = array<i64: 16, 256>}, {pipeline_mode = #tpu.pipeline_mode<synchronous>, transform_indices = @transform_1, window_bounds = array<i64: 256, 4>}, {pipeline_mode = #tpu.pipeline_mode<synchronous>, transform_indices = @transform_2, window_bounds = array<i64: 1, 4>}, {pipeline_mode = #tpu.pipeline_mode<synchronous>, transform_indices = @transform_3, window_bounds = array<i64: 256, 1024>}, {pipeline_mode = #tpu.pipeline_mode<synchronous>, transform_indices = @transform_4, window_bounds = array<i64: 1, 1024>}, {pipeline_mode = #tpu.pipeline_mode<synchronous>, transform_indices = @transform_5, window_bounds = array<i64: 1024, 128>}, {pipeline_mode = #tpu.pipeline_mode<synchronous>, transform_indices = @transform_6, window_bounds = array<i64: 4, 128>}, {pipeline_mode = #tpu.pipeline_mode<synchronous>, transform_indices = @transform_7, window_bounds = array<i64: 4, 1024>}, {transform_indices = @transform_8, window_bounds = array<i64: 16, 128>}]} {
    %c0 = arith.constant 0 : index
    %c0_0 = arith.constant 0 : index
    %0 = vector.load %arg1[%c0, %c0_0] : memref<16x256xf32, #tpu.memory_space<vmem>>, vector<16x256xf32>
    %cst = arith.constant dense<0.000000e+00> : vector<16xf32>
    %1 = vector.multi_reduction <add>, %0, %cst [1] : vector<16x256xf32> to vector<16xf32>
    %2 = vector.shape_cast %1 : vector<16xf32> to vector<16x1xf32>
    %cst_1 = arith.constant 2.560000e+02 : f32
    %3 = vector.broadcast %cst_1 : f32 to vector<16x1xf32>
    %4 = arith.divf %2, %3 : vector<16x1xf32>
    %5 = vector.broadcast %4 : vector<16x1xf32> to vector<16x256xf32>
    %6 = arith.subf %0, %5 : vector<16x256xf32>
    %7 = arith.mulf %6, %6 : vector<16x256xf32>
    %cst_2 = arith.constant dense<0.000000e+00> : vector<16xf32>
    %8 = vector.multi_reduction <add>, %7, %cst_2 [1] : vector<16x256xf32> to vector<16xf32>
    %9 = vector.shape_cast %8 : vector<16xf32> to vector<16x1xf32>
    %cst_3 = arith.constant 2.560000e+02 : f32
    %10 = vector.broadcast %cst_3 : f32 to vector<16x1xf32>
    %11 = arith.divf %9, %10 : vector<16x1xf32>
    %cst_4 = arith.constant 9.99999974E-6 : f32
    %12 = vector.broadcast %cst_4 : f32 to vector<16x1xf32>
    %13 = arith.addf %11, %12 : vector<16x1xf32>
    %14 = math.rsqrt %13 : vector<16x1xf32>
    %15 = vector.broadcast %14 : vector<16x1xf32> to vector<16x256xf32>
    %16 = arith.mulf %6, %15 : vector<16x256xf32>
    %17 = arith.truncf %16 : vector<16x256xf32> to vector<16x256xbf16>
    %c0_5 = arith.constant 0 : index
    %c0_6 = arith.constant 0 : index
    %18 = vector.load %arg2[%c0_5, %c0_6] : memref<256x4xbf16, #tpu.memory_space<vmem>>, vector<256x4xbf16>
    %cst_7 = arith.constant dense<0.000000e+00> : vector<16x4xf32>
    %19 = tpu.matmul %17, %18, %cst_7 {dimension_numbers = #tpu.dot_dimension_numbers<[1], [0], [0], [1], [0, 0, 1, 1], [], []>} : vector<16x256xbf16>, vector<256x4xbf16>, vector<16x4xf32> -> vector<16x4xf32>
    %c0_8 = arith.constant 0 : index
    %c0_9 = arith.constant 0 : index
    %20 = vector.load %arg3[%c0_8, %c0_9] : memref<1x4xf32, #tpu.memory_space<vmem>>, vector<1x4xf32>
    %21 = vector.broadcast %20 : vector<1x4xf32> to vector<16x4xf32>
    %22 = arith.addf %19, %21 : vector<16x4xf32>
    %cst_10 = arith.constant dense<0xFF800000> : vector<16xf32>
    %23 = vector.multi_reduction <maximumf>, %22, %cst_10 [1] : vector<16x4xf32> to vector<16xf32>
    %24 = vector.shape_cast %23 : vector<16xf32> to vector<16x1xf32>
    %25 = vector.broadcast %24 : vector<16x1xf32> to vector<16x4xf32>
    %26 = arith.subf %22, %25 : vector<16x4xf32>
    %27 = math.exp %26 : vector<16x4xf32>
    %cst_11 = arith.constant dense<0.000000e+00> : vector<16xf32>
    %28 = vector.multi_reduction <add>, %27, %cst_11 [1] : vector<16x4xf32> to vector<16xf32>
    %29 = vector.shape_cast %28 : vector<16xf32> to vector<16x1xf32>
    %30 = tpu.reciprocal %29 {approx = true} : vector<16x1xf32> -> vector<16x1xf32>
    %31 = vector.broadcast %30 : vector<16x1xf32> to vector<16x4xf32>
    %32 = arith.mulf %27, %31 : vector<16x4xf32>
    %33 = arith.truncf %0 : vector<16x256xf32> to vector<16x256xbf16>
    %c0_12 = arith.constant 0 : index
    %c0_13 = arith.constant 0 : index
    %34 = vector.load %arg4[%c0_12, %c0_13] : memref<256x1024xbf16, #tpu.memory_space<vmem>>, vector<256x1024xbf16>
    %cst_14 = arith.constant dense<0.000000e+00> : vector<16x1024xf32>
    %35 = tpu.matmul %33, %34, %cst_14 {dimension_numbers = #tpu.dot_dimension_numbers<[1], [0], [0], [1], [0, 0, 1, 1], [], []>} : vector<16x256xbf16>, vector<256x1024xbf16>, vector<16x1024xf32> -> vector<16x1024xf32>
    %c0_15 = arith.constant 0 : index
    %c0_16 = arith.constant 0 : index
    %36 = vector.load %arg5[%c0_15, %c0_16] : memref<1x1024xf32, #tpu.memory_space<vmem>>, vector<1x1024xf32>
    %37 = vector.broadcast %36 : vector<1x1024xf32> to vector<16x1024xf32>
    %38 = arith.addf %35, %37 : vector<16x1024xf32>
    %cst_17 = arith.constant 0.000000e+00 : f32
    %39 = vector.broadcast %cst_17 : f32 to vector<16x1024xf32>
    %40 = arith.maximumf %38, %39 : vector<16x1024xf32>
    %41 = arith.truncf %32 : vector<16x4xf32> to vector<16x4xbf16>
    %c0_18 = arith.constant 0 : index
    %c0_19 = arith.constant 0 : index
    %42 = vector.load %arg8[%c0_18, %c0_19] : memref<4x1024xbf16, #tpu.memory_space<vmem>>, vector<4x1024xbf16>
    %cst_20 = arith.constant dense<0.000000e+00> : vector<16x1024xf32>
    %43 = tpu.matmul %41, %42, %cst_20 {dimension_numbers = #tpu.dot_dimension_numbers<[1], [0], [0], [1], [0, 0, 1, 1], [], []>} : vector<16x4xbf16>, vector<4x1024xbf16>, vector<16x1024xf32> -> vector<16x1024xf32>
    %44 = arith.mulf %43, %40 : vector<16x1024xf32>
    %45 = arith.truncf %44 : vector<16x1024xf32> to vector<16x1024xbf16>
    %c0_21 = arith.constant 0 : index
    %c0_22 = arith.constant 0 : index
    %46 = vector.load %arg6[%c0_21, %c0_22] : memref<1024x128xbf16, #tpu.memory_space<vmem>>, vector<1024x128xbf16>
    %cst_23 = arith.constant dense<0.000000e+00> : vector<16x128xf32>
    %47 = tpu.matmul %45, %46, %cst_23 {dimension_numbers = #tpu.dot_dimension_numbers<[1], [0], [0], [1], [0, 0, 1, 1], [], []>} : vector<16x1024xbf16>, vector<1024x128xbf16>, vector<16x128xf32> -> vector<16x128xf32>
    %48 = arith.truncf %32 : vector<16x4xf32> to vector<16x4xbf16>
    %c0_24 = arith.constant 0 : index
    %c0_25 = arith.constant 0 : index
    %49 = vector.load %arg7[%c0_24, %c0_25] : memref<4x128xbf16, #tpu.memory_space<vmem>>, vector<4x128xbf16>
    %cst_26 = arith.constant dense<0.000000e+00> : vector<16x128xf32>
    %50 = tpu.matmul %48, %49, %cst_26 {dimension_numbers = #tpu.dot_dimension_numbers<[1], [0], [0], [1], [0, 0, 1, 1], [], []>} : vector<16x4xbf16>, vector<4x128xbf16>, vector<16x128xf32> -> vector<16x128xf32>
    %51 = arith.addf %47, %50 : vector<16x128xf32>
    %c0_27 = arith.constant 0 : index
    %c0_28 = arith.constant 0 : index
    %52 = vector.load %arg9[%c0_27, %c0_28] : memref<16x128xf32, #tpu.memory_space<vmem>>, vector<16x128xf32>
    tpu.vector_store %arg9[%c0_27, %c0_28], %51 {strides = array<i32>} : memref<16x128xf32, #tpu.memory_space<vmem>>, vector<16x128xf32>,
    return
  }
  func.func @transform_0(%arg0: i32) -> (i32, i32) {
    %c0_i32 = arith.constant 0 : i32
    %c0_i32_0 = arith.constant 0 : i32
    return %arg0, %c0_i32 : i32, i32
  }
  func.func @transform_1(%arg0: i32) -> (i32, i32) {
    %c0_i32 = arith.constant 0 : i32
    %c0_i32_0 = arith.constant 0 : i32
    %c0_i32_1 = arith.constant 0 : i32
    return %c0_i32, %c0_i32_0 : i32, i32
  }
  func.func @transform_2(%arg0: i32) -> (i32, i32) {
    %c0_i32 = arith.constant 0 : i32
    %c0_i32_0 = arith.constant 0 : i32
    %c0_i32_1 = arith.constant 0 : i32
    return %c0_i32, %c0_i32_0 : i32, i32
  }
  func.func @transform_3(%arg0: i32) -> (i32, i32) {
    %c0_i32 = arith.constant 0 : i32
    %c0_i32_0 = arith.constant 0 : i32
    %c0_i32_1 = arith.constant 0 : i32
    return %c0_i32, %c0_i32_0 : i32, i32
  }
  func.func @transform_4(%arg0: i32) -> (i32, i32) {
    %c0_i32 = arith.constant 0 : i32
    %c0_i32_0 = arith.constant 0 : i32
    %c0_i32_1 = arith.constant 0 : i32
    return %c0_i32, %c0_i32_0 : i32, i32
  }
  func.func @transform_5(%arg0: i32) -> (i32, i32) {
    %c0_i32 = arith.constant 0 : i32
    %c0_i32_0 = arith.constant 0 : i32
    %c0_i32_1 = arith.constant 0 : i32
    return %c0_i32, %c0_i32_0 : i32, i32
  }
  func.func @transform_6(%arg0: i32) -> (i32, i32) {
    %c0_i32 = arith.constant 0 : i32
    %c0_i32_0 = arith.constant 0 : i32
    %c0_i32_1 = arith.constant 0 : i32
    return %c0_i32, %c0_i32_0 : i32, i32
  }
  func.func @transform_7(%arg0: i32) -> (i32, i32) {
    %c0_i32 = arith.constant 0 : i32
    %c0_i32_0 = arith.constant 0 : i32
    %c0_i32_1 = arith.constant 0 : i32
    return %c0_i32, %c0_i32_0 : i32, i32
  }
  func.func @transform_8(%arg0: i32) -> (i32, i32) {
    %c0_i32 = arith.constant 0 : i32
    %c0_i32_0 = arith.constant 0 : i32
    return %arg0, %c0_i32 : i32, i32
  }
}

</mosaic_0001>

<bundles_post_ra>
// kernel: tpu_custom_call.1
= control target key start
LH: loop header
LB: loop body
LE: loop exit
PB: predicated region body
PF: predicated region fallthrough
CT: control target
= control target key end

     0   :  { %13 = vsyncpa [#allocation3], 0  ;;  %s3065_s0 = inlined_call_operand.vmem [shape: f32[16,256], index: 0, kind: input, shape index: {}]   ;;  %s3066_s1 = inlined_call_operand.vmem [shape: bf16[256,4], index: 1, kind: input, shape index: {}]   ;;  %s3067_s2 = inlined_call_operand.vmem [shape: f32[1,4], index: 2, kind: input, shape index: {}]   ;;  %s3068_s3 = inlined_call_operand.hbm [shape: bf16[256,1024], index: 3, kind: input, shape index: {}]   ;;  %s3069_s4 = inlined_call_operand.vmem [shape: f32[1,1024], index: 4, kind: input, shape index: {}]   ;;  %s3070_s5 = inlined_call_operand.hbm [shape: bf16[1024,128], index: 5, kind: input, shape index: {}]   ;;  %s3071_s6 = inlined_call_operand.vmem [shape: bf16[4,128], index: 6, kind: input, shape index: {}]   ;;  %s3072_s7 = inlined_call_operand.vmem [shape: bf16[4,1024], index: 7, kind: input, shape index: {}]   ;;  %s3073_s8 = inlined_call_operand.hbm [shape: f32[16,128], index: 8, kind: output, shape index: {}]  }
   0x1   :  { %14 = vsyncpa [#allocation6], 0 }
   0x2   :  { %15 = vsyncpa [#allocation4], 0  ;;  %s2810_s27 = smov [#allocation2]  }
   0x3   :  { %s27_s28 = sshll.u32 %s2810_s27, 4  ;;  %s28_s28 = int_to_ptr.vmem [resolvable:$true] %s27_s28 }
   0x4   :  { %s2752_s29 = scalar_lea.vmem %s28_s28, 16384  ;;  %p2757_p1 = scmp.lt.s32.totalorder %s28_s28, %s28_s28 }
   0x5   :  { %p2753_p0 = scmp.ne.s32.totalorder %s28_s28, %s2752_s29  ;;  %p2758_p2 = scmp.lt.s32.totalorder %s2752_s29, %s2752_s29 }
   0x7   :  { %p2759_p3 = por %p2758_p2, %p2757_p1 }
   0x9   :  { %p2760_p4 = pnand %p2759_p3, %p2753_p0 }
   0xb   :  { %2763 = shalt.err (!%p2760_p4)
}
   0xc   :  { %s2811_s30 = smov 512   ;;  %s2812_s9 = smov 32  }
   0xd   :  { %33 = dma.hbm_to_vmem [thread:$0]  %s3068_s3, 16384, %s28_s28, [#allocation3], %s2811_s30, %s2811_s30, %s2812_s9  }
   0xe   :  { %s2813_s12 = smov [#allocation5]  }
   0xf   :  { %s41_s13 = sshll.u32 %s2813_s12, 4  ;;  %s42_s13 = int_to_ptr.vmem [resolvable:$true] %s41_s13 }
  0x10   :  { %s2772_s14 = scalar_lea.vmem %s42_s13, 8192  ;;  %p2777_p6 = scmp.lt.s32.totalorder %s42_s13, %s42_s13 }
  0x11   :  { %p2773_p5 = scmp.ne.s32.totalorder %s42_s13, %s2772_s14  ;;  %p2778_p7 = scmp.lt.s32.totalorder %s2772_s14, %s2772_s14 }
  0x13   :  { %p2779_p8 = por %p2778_p7, %p2777_p6 }
  0x15   :  { %p2780_p9 = pnand %p2779_p8, %p2773_p5 }
  0x17   :  { %2783 = shalt.err (!%p2780_p9)
}
  0x18   :  { %s2814_s15 = smov 64   ;;  %s2815_s16 = smov 4  }
  0x19   :  { %47 = dma.hbm_to_vmem [thread:$0]  %s3070_s5, 8192, %s42_s13, [#allocation6], %s2814_s15, %s2814_s15, %s2815_s16  }
  0x1a   :  { %2804 = dma.done.wait [#allocation3], 16384  }
  0x1b   :  { %2805 = vsyncadd [#allocation3], 4294950912 }
  0x1c   :  { %2806 = dma.done.wait [#allocation6], 8192  }
  0x1d   :  { %2807 = vsyncadd [#allocation6], 4294959104  ;;  %v2877_v0 = vld [vmem:[%s3065_s0] sm:$0xff]  ;;  %v60_v1 = vld [vmem:[%s3065_s0 + $0x8] sm:$0xff]  ;;  %vm274_vm0 = vcmask 31744   ;;  %vm1339_vm1 = vcmask 1041408  }
  0x1e   :  { %v2885_v2 = vld [vmem:[%s3065_s0 + $0x10] sm:$0xff]  ;;  %v63_v3 = vadd.f32 %v60_v1, %v2877_v0  ;;  %v62_v4 = vld [vmem:[%s3065_s0 + $0x18] sm:$0xff]  ;;  %v2654_v25 = vld [vmem:[%s3066_s1 + $0x68] sm:$0xff]   ;;  %vm2819_vm2 = vmmov 0  }
  0x1f   :  { %v2891_v5 = vpack.c.bf16 %v62_v4, %v60_v1  ;;  %v66_v6 = vadd.f32 %v62_v4, %v2885_v2  ;;  %v2650_v7 = vld [vmem:[%s3066_s1 + $0x78] sm:$0xff]   ;;  %v2652_v9 = vld [vmem:[%s3066_s1 + $0x70] sm:$0xff]   ;;  %v2655_v26 = vld [vmem:[%s3066_s1 + $0x28] sm:$0xff]  }
  0x20   :  { %64 = vadd.xlane.f32.xlu0 %v63_v3  ;;  %v2651_v8 = vld [vmem:[%s3066_s1 + $0x38] sm:$0xff]   ;;  %2519 = vmatprep.subr.bf16.mxu0 %v2650_v7  ;;  %v2653_v24 = vld [vmem:[%s3066_s1 + $0x30] sm:$0xff]   ;;  %v2656_v27 = vld [vmem:[%s3066_s1 + $0x60] sm:$0xff]  }
  0x21   :  { %1141 = vmatprep.mubr.bf16.mxu1 %v2891_v5  ;;  %2520 = vmatpush3.bf16.msra.mxu0 %v2651_v8  ;;  %v2657_v28 = vld [vmem:[%s3066_s1 + $0x20] sm:$0xff]   ;;  %v2658_v29 = vld [vmem:[%s3066_s1 + $0x58] sm:$0xff]   ;;  %v2660_v31 = vld [vmem:[%s3066_s1 + $0x50] sm:$0xff]  }
  0x22   :  { %2521 = vmatprep.subr.bf16.mxu0 %v2652_v9  ;;  %v2659_v30 = vld [vmem:[%s3066_s1 + $0x18] sm:$0xff]   ;;  %v2661_v32 = vld [vmem:[%s3066_s1 + $0x10] sm:$0xff]   ;;  %v2662_v33 = vld [vmem:[%s3066_s1 + $0x48] sm:$0xff]  }
  0x23   :  { %v2663_v34 = vld [vmem:[%s3066_s1 + $0x8] sm:$0xff]   ;;  %v2664_v35 = vld [vmem:[%s3066_s1 + $0x40] sm:$0xff]  }
  0x24   :  { %67 = vadd.xlane.f32.xlu0 %v66_v6  ;;  %v2665_v36 = vld [vmem:[%s3066_s1] sm:$0xff]   ;;  %v356_v7 = vld [vmem:[#allocation2 + $0x1c8] sm:$0xff] }
  0x25   :  { %2522 = vmatpush3.bf16.msra.mxu0 %v2653_v24  ;;  %v2301_v53 = vld [vmem:[%s3067_s2] ss:$0 sm:$0xff]  ;;  %v360_v8 = vld [vmem:[#allocation2 + $0x1e8] sm:$0xff] }
  0x26   :  { %2523 = vmatprep.subr.bf16.mxu0 %v2654_v25  ;;  %v355_v62 = vld [vmem:[#allocation2 + $0x1c0] sm:$0xff]  ;;  %v332_v25 = vld [vmem:[#allocation2 + $0x108] sm:$0xff] }
  0x27   :  { %v359_v63 = vld [vmem:[#allocation2 + $0x1e0] sm:$0xff] }
  0x28   :  { %v2375_v3 = vcombine.high %v355_v62, %v359_v63  ;;  %v351_v6 = vld [vmem:[#allocation2 + $0x1a0] sm:$0xff] }
  0x29   :  { %2524 = vmatpush3.bf16.msra.mxu0 %v2655_v26  ;;  %v336_v26 = vld [vmem:[#allocation2 + $0x128] sm:$0xff] }
  0x2a   :  { %2525 = vmatprep.subr.bf16.mxu0 %v2656_v27  ;;  %1109 = vmatprep.subr.bf16.mxu1 %v2375_v3  ;;  %v423_v3 = vld [vmem:[#allocation2 + $0x3e0] sm:$0xff] }
  0x2d   :  { %2526 = vmatpush3.bf16.msra.mxu0 %v2657_v28 }
  0x2e   :  { %2527 = vmatprep.subr.bf16.mxu0 %v2658_v29 }
  0x31   :  { %2528 = vmatpush3.bf16.msra.mxu0 %v2659_v30  ;;  %v323_v30 = vld [vmem:[#allocation2 + $0xc0] sm:$0xff] }
  0x32   :  { %2529 = vmatprep.subr.bf16.mxu0 %v2660_v31  ;;  %v327_v31 = vld [vmem:[#allocation2 + $0xe0] sm:$0xff] }
  0x35   :  { %2530 = vmatpush3.bf16.msra.mxu0 %v2661_v32  ;;  %v2353_v32 = vcombine.high %v332_v25, %v336_v26 }
  0x36   :  { %2531 = vmatprep.subr.bf16.mxu0 %v2662_v33  ;;  %v324_v33 = vld [vmem:[#allocation2 + $0xc8] sm:$0xff] }
  0x39   :  { %2532 = vmatpush3.bf16.msra.mxu0 %v2663_v34  ;;  %v328_v34 = vld [vmem:[#allocation2 + $0xe8] sm:$0xff] }
  0x3a   :  { %2533 = vmatprep.subr.bf16.mxu0 %v2664_v35 }
  0x3d   :  { %2534 = vmatpush3.bf16.msra.mxu0 %v2665_v36  ;;  %v2343_v36 = vcombine.high %v323_v30, %v327_v31 }
  0xa9   :  { %v65_v10 = vpop.xlane.xlu0 %64 }
  0xaa   :  { %v70_v11 = vmul.f32 0.00390625, %v65_v10  ;;  %v2376_v10 = vcombine.low %v356_v7, %v360_v8 }
  0xac   :  { %v72_v12 = vsub.f32 %v2877_v0, %v70_v11  ;;  %v73_v13 = vsub.f32 %v60_v1, %v70_v11  ;;  %v347_v1 = vld [vmem:[#allocation2 + $0x180] sm:$0xff]  ;;  %v2377_v11 = vcombine.high %v356_v7, %v360_v8  ;;  %v424_v7 = vld [vmem:[#allocation2 + $0x3e8] sm:$0xff] }
  0xad   :  { %v68_v14 = vpop.xlane.xlu0 %67  ;;  %v2367_v9 = vcombine.high %v347_v1, %v351_v6 }
  0xae   :  { %v71_v15 = vmul.f32 0.00390625, %v68_v14  ;;  %v76_v16 = vmul.f32 %v72_v12, %v72_v12  ;;  %v77_v17 = vmul.f32 %v73_v13, %v73_v13  ;;  %v348_v14 = vld [vmem:[#allocation2 + $0x188] sm:$0xff]  ;;  %1152 = vmatprep.subr.bf16.mxu0 %v2377_v11  ;;  %v411_v11 = vld [vmem:[#allocation2 + $0x380] sm:$0xff] }
  0xb0   :  { %v74_v18 = vsub.f32 %v2885_v2, %v71_v15  ;;  %v75_v19 = vsub.f32 %v62_v4, %v71_v15  ;;  %v80_v20 = vadd.f32 %v77_v17, %v76_v16  ;;  %v2374_v4 = vcombine.low %v355_v62, %v359_v63  ;;  %v352_v15 = vld [vmem:[#allocation2 + $0x1a8] sm:$0xff] }
  0xb1   :  { %v2366_v16 = vcombine.low %v347_v1, %v351_v6  ;;  %v2369_v17 = vcombine.high %v348_v14, %v352_v15  ;;  %v419_v1 = vld [vmem:[#allocation2 + $0x3c0] sm:$0xff]  ;;  %v420_v6 = vld [vmem:[#allocation2 + $0x3c8] sm:$0xff] }
  0xb2   :  { %81 = vadd.xlane.f32.xlu1 %v80_v20  ;;  %v78_v21 = vmul.f32 %v74_v18, %v74_v18  ;;  %v79_v22 = vmul.f32 %v75_v19, %v75_v19  ;;  %1110 = vmatpush1.bf16.msra.mxu1 %v2374_v4 }
  0xb3   :  { %1111 = vmatprep.subr.bf16.mxu1 %v2367_v9  ;;  %v2439_v9 = vcombine.high %v419_v1, %v423_v3 }
  0xb4   :  { %v83_v23 = vadd.f32 %v79_v22, %v78_v21  ;;  %v2368_v21 = vcombine.low %v348_v14, %v352_v15  ;;  %v331_v22 = vld [vmem:[#allocation2 + $0x100] sm:$0xff]  ;;  %v412_v14 = vld [vmem:[#allocation2 + $0x388] sm:$0xff] }
  0xb5   :  { %v416_v15 = vld [vmem:[#allocation2 + $0x3a8] sm:$0xff] }
  0xb6   :  { %84 = vadd.xlane.f32.xlu1 %v83_v23  ;;  %v335_v23 = vld [vmem:[#allocation2 + $0x120] sm:$0xff]  ;;  %1112 = vmatpush1.bf16.msra.mxu1 %v2366_v16  ;;  %v2438_v16 = vcombine.low %v419_v1, %v423_v3  ;;  %v364_v1 = vld [vmem:[#allocation2 + $0x208] sm:$0xff] }
  0xb7   :  { %v2351_v28 = vcombine.high %v331_v22, %v335_v23  ;;  %v2350_v35 = vcombine.low %v331_v22, %v335_v23  ;;  %v404_v22 = vld [vmem:[#allocation2 + $0x348] sm:$0xff] }
  0xb8   :  { %v408_v23 = vld [vmem:[#allocation2 + $0x368] sm:$0xff] }
  0xb9   :  { %v368_v3 = vld [vmem:[#allocation2 + $0x228] sm:$0xff] }
 0x13b   :  { %v82_v37 = vpop.xlane.xlu1 %81 }
 0x13c   :  { %v86_v38 = vmul.f32 0.00390625, %v82_v37  ;;  %v2352_v37 = vcombine.low %v332_v25, %v336_v26  ;;  %v2432_v26 = vcombine.low %v412_v14, %v416_v15 }
 0x13e   :  { %v88_v39 = vadd.f32 1e-05, %v86_v38  ;;  %v315_v38 = vld [vmem:[#allocation2 + $0x80] sm:$0xff] }
 0x13f   :  { %v85_v40 = vpop.xlane.xlu1 %84 }
 0x140   :  { %v87_v41 = vmul.f32 0.00390625, %v85_v40  ;;  %2732 = vrsqrt.f32 %v88_v39  ;;  %v319_v39 = vld [vmem:[#allocation2 + $0xa0] sm:$0xff]  ;;  %v2345_v40 = vcombine.high %v324_v33, %v328_v34 }
 0x142   :  { %v89_v42 = vadd.f32 1e-05, %v87_v41  ;;  %v316_v41 = vld [vmem:[#allocation2 + $0x88] sm:$0xff] }
 0x144   :  { %2734 = vrsqrt.f32 %v89_v42  ;;  %v320_v42 = vld [vmem:[#allocation2 + $0xa8] sm:$0xff] }
 0x14d   :  { %v2733_v43 = vpop.eup %2732 }
 0x14e   :  { %v93_v45 = vmul.f32 %v2733_v43, %v73_v13  ;;  %v92_v47 = vmul.f32 %v2733_v43, %v72_v12  ;;  %v339_v12 = vld [vmem:[#allocation2 + $0x140] sm:$0xff]  ;;  %v2342_v43 = vcombine.low %v323_v30, %v327_v31  ;;  %v396_v30 = vld [vmem:[#allocation2 + $0x308] sm:$0xff] }
 0x14f   :  { %v343_v13 = vld [vmem:[#allocation2 + $0x160] sm:$0xff]  ;;  %v400_v31 = vld [vmem:[#allocation2 + $0x328] sm:$0xff] }
 0x150   :  { %v2359_v20 = vcombine.high %v339_v12, %v343_v13  ;;  %v2358_v27 = vcombine.low %v339_v12, %v343_v13  ;;  %v415_v12 = vld [vmem:[#allocation2 + $0x3a0] sm:$0xff]  ;;  %v2441_v13 = vcombine.high %v420_v6, %v424_v7 }
 0x151   :  { %v2735_v44 = vpop.eup %2734 }
 0x152   :  { %v95_v46 = vmul.f32 %v2735_v44, %v75_v19  ;;  %v94_v48 = vmul.f32 %v2735_v44, %v74_v18  ;;  %v340_v18 = vld [vmem:[#allocation2 + $0x148] sm:$0xff]  ;;  %1113 = vmatprep.subr.bf16.mxu1 %v2359_v20  ;;  %v2335_v44 = vcombine.high %v315_v38, %v319_v39  ;;  %v407_v20 = vld [vmem:[#allocation2 + $0x360] sm:$0xff] }
 0x153   :  { %v344_v19 = vld [vmem:[#allocation2 + $0x168] sm:$0xff]  ;;  %1114 = vmatpush1.bf16.msra.mxu1 %v2358_v27  ;;  %v395_v27 = vld [vmem:[#allocation2 + $0x300] sm:$0xff] }
 0x154   :  { %v97_v49 = vpack.c.bf16 %v95_v46, %v93_v45  ;;  %v96_v50 = vpack.c.bf16 %v94_v48, %v92_v47  ;;  %v2361_v24 = vcombine.high %v340_v18, %v344_v19  ;;  %v2360_v29 = vcombine.low %v340_v18, %v344_v19  ;;  %1115 = vmatprep.subr.bf16.mxu1 %v2351_v28  ;;  %v307_v46 = vld [vmem:[#allocation2 + $0x40] sm:$0xff] }
 0x155   :  { %v2344_v45 = vcombine.low %v324_v33, %v328_v34  ;;  %v311_v47 = vld [vmem:[#allocation2 + $0x60] sm:$0xff]  ;;  %v2337_v48 = vcombine.high %v316_v41, %v320_v42  ;;  %v2440_v18 = vcombine.low %v420_v6, %v424_v7  ;;  %v2424_v34 = vcombine.low %v404_v22, %v408_v23 }
 0x156   :  { %265 = vmatprep.mubr.bf16.mxu0 %v97_v49  ;;  %v308_v49 = vld [vmem:[#allocation2 + $0x48] sm:$0xff]  ;;  %v403_v19 = vld [vmem:[#allocation2 + $0x340] sm:$0xff] }
 0x157   :  { %266 = vmatmul.mubr.bf16.vlgmr.msra.gmra.mxu0 %v96_v50  ;;  %1116 = vmatpush1.bf16.msra.mxu1 %v2350_v35  ;;  %v312_v50 = vld [vmem:[#allocation2 + $0x68] sm:$0xff]  ;;  %v2423_v25 = vcombine.high %v403_v19, %v407_v20  ;;  %v399_v28 = vld [vmem:[#allocation2 + $0x320] sm:$0xff] }
 0x158   :  { %1184 = vmatprep.mubr.bf16.mxu0 %v2891_v5  ;;  %1153 = vmatpush1.bf16.msra.mxu0 %v2376_v10  ;;  %v2328_v63 = vcombine.low %v308_v49, %v312_v50  ;;  %v2415_v33 = vcombine.high %v395_v27, %v399_v28  ;;  %v387_v35 = vld [vmem:[#allocation2 + $0x2c0] sm:$0xff] }
 0x159   :  { %1154 = vmatprep.subr.bf16.mxu0 %v2369_v17  ;;  %1117 = vmatprep.subr.bf16.mxu1 %v2343_v36  ;;  %v2431_v17 = vcombine.high %v411_v11, %v415_v12  ;;  %v391_v36 = vld [vmem:[#allocation2 + $0x2e0] sm:$0xff] }
 0x15b   :  { %1118 = vmatpush1.bf16.msra.mxu1 %v2342_v43  ;;  %v379_v43 = vld [vmem:[#allocation2 + $0x280] sm:$0xff] }
 0x15c   :  { %1155 = vmatpush1.bf16.msra.mxu0 %v2368_v21  ;;  %1119 = vmatprep.subr.bf16.mxu1 %v2335_v44  ;;  %v2433_v21 = vcombine.high %v412_v14, %v416_v15  ;;  %v383_v44 = vld [vmem:[#allocation2 + $0x2a0] sm:$0xff]  ;;  %v2384_v15 = vcombine.low %v364_v1, %v368_v3 }
 0x15d   :  { %1156 = vmatprep.subr.bf16.mxu0 %v2361_v24  ;;  %v2430_v24 = vcombine.low %v411_v11, %v415_v12  ;;  %v358_v11 = vld [vmem:[#allocation2 + $0x1d8] sm:$0xff] }
 0x15e   :  { %v362_v12 = vld [vmem:[#allocation2 + $0x1f8] sm:$0xff] }
 0x160   :  { %1157 = vmatpush1.bf16.msra.mxu0 %v2360_v29  ;;  %v2425_v29 = vcombine.high %v404_v22, %v408_v23 }
 0x161   :  { %1158 = vmatprep.subr.bf16.mxu0 %v2353_v32  ;;  %v2422_v32 = vcombine.low %v403_v19, %v407_v20  ;;  %v2959_v19 = vpack.c.bf16 %v2885_v2, %v2877_v0  ;;  %v350_v20 = vld [vmem:[#allocation2 + $0x198] sm:$0xff] }
 0x164   :  { %1159 = vmatpush1.bf16.msra.mxu0 %v2352_v37  ;;  %v2417_v37 = vcombine.high %v396_v30, %v400_v31 }
 0x165   :  { %1160 = vmatprep.subr.bf16.mxu0 %v2345_v40  ;;  %v2414_v40 = vcombine.low %v395_v27, %v399_v28  ;;  %v342_v28 = vld [vmem:[#allocation2 + $0x158] sm:$0xff] }
 0x168   :  { %1161 = vmatpush1.bf16.msra.mxu0 %v2344_v45 }
 0x169   :  { %1162 = vmatprep.subr.bf16.mxu0 %v2337_v48  ;;  %v2406_v48 = vcombine.low %v387_v35, %v391_v36 }
 0x217   :  { %v2535_v51 = vpop.f32.mrf.mxu0 }
 0x219   :  { %v2536_v52 = vpop.f32.mrf.mxu0 }
 0x21a   :  { %v2537_v54 = vadd.f32 %v2536_v52, %v2535_v51  ;;  %v2334_v51 = vcombine.low %v315_v38, %v319_v39  ;;  %v2327_v52 = vcombine.high %v307_v46, %v311_v47  ;;  %v388_v38 = vld [vmem:[#allocation2 + $0x2c8] sm:$0xff] }
 0x21b   :  { %v2538_v55 = vpop.f32.mrf.mxu0  ;;  %v392_v39 = vld [vmem:[#allocation2 + $0x2e8] sm:$0xff] }
 0x21c   :  { %v2949_v56 = vadd.f32 %v2537_v54, %v2301_v53  ;;  %v299_v54 = vld [vmem:[#allocation2] sm:$0xff]  ;;  %1120 = vmatpush1.bf16.msra.mxu1 %v2334_v51  ;;  %v2409_v45 = vcombine.high %v388_v38, %v392_v39 }
 0x21d   :  { %v2539_v57 = vpop.f32.mrf.mxu0  ;;  %1121 = vmatprep.subr.bf16.mxu1 %v2327_v52  ;;  %v371_v51 = vld [vmem:[#allocation2 + $0x240] sm:$0xff] }
 0x21e   :  { %v2540_v58 = vadd.f32 %v2539_v57, %v2538_v55  ;;  %v275_v59 = vsel %vm274_vm0, %v2949_v56, -inf  ;;  %v303_v55 = vld [vmem:[#allocation2 + $0x20] sm:$0xff]  ;;  %v2329_v57 = vcombine.high %v308_v49, %v312_v50  ;;  %v2399_v49 = vcombine.high %v379_v43, %v383_v44 }
 0x21f   :  { %276 = vmax.xlane.f32.xlu0 %v275_v59  ;;  %v304_v59 = vld [vmem:[#allocation2 + $0x28] sm:$0xff]  ;;  %v2319_v62 = vcombine.high %v299_v54, %v303_v55  ;;  %v2318_v8 = vcombine.low %v299_v54, %v303_v55  ;;  %v2408_v50 = vcombine.low %v388_v38, %v392_v39  ;;  %v375_v52 = vld [vmem:[#allocation2 + $0x260] sm:$0xff]  ;;  %v325_v39 = vld [vmem:[#allocation2 + $0xd0] sm:$0xff] }
 0x220   :  { %v2953_v60 = vadd.f32 %v2540_v58, %v2301_v53  ;;  %v2336_v53 = vcombine.low %v316_v41, %v320_v42  ;;  %v300_v58 = vld [vmem:[#allocation2 + $0x8] sm:$0xff]  ;;  %v2407_v41 = vcombine.high %v387_v35, %v391_v36  ;;  %v2416_v42 = vcombine.low %v396_v30, %v400_v31  ;;  %v333_v31 = vld [vmem:[#allocation2 + $0x110] sm:$0xff]  ;;  %v338_v35 = vld [vmem:[#allocation2 + $0x138] sm:$0xff] }
 0x221   :  { %v2321_v4 = vcombine.high %v300_v58, %v304_v59  ;;  %v2320_v10 = vcombine.low %v300_v58, %v304_v59  ;;  %v372_v54 = vld [vmem:[#allocation2 + $0x248] sm:$0xff]  ;;  %v2391_v58 = vcombine.high %v371_v51, %v375_v52 }
 0x222   :  { %v278_v61 = vsel %vm274_vm0, %v2953_v60, -inf  ;;  %1163 = vmatpush1.bf16.msra.mxu0 %v2336_v53  ;;  %v376_v55 = vld [vmem:[#allocation2 + $0x268] sm:$0xff] }
 0x223   :  { %279 = vmax.xlane.f32.xlu1 %v278_v61  ;;  %v2326_v61 = vcombine.low %v307_v46, %v311_v47  ;;  %1164 = vmatprep.subr.bf16.mxu0 %v2329_v57  ;;  %v380_v46 = vld [vmem:[#allocation2 + $0x288] sm:$0xff]  ;;  %v2398_v57 = vcombine.low %v379_v43, %v383_v44  ;;  %v2392_v7 = vcombine.low %v372_v54, %v376_v55  ;;  %v330_v43 = vld [vmem:[#allocation2 + $0xf8] sm:$0xff] }
 0x224   :  { %v384_v47 = vld [vmem:[#allocation2 + $0x2a8] sm:$0xff] }
 0x225   :  { %1122 = vmatpush1.bf16.msra.mxu1 %v2326_v61  ;;  %v2401_v53 = vcombine.high %v380_v46, %v384_v47  ;;  %v2400_v59 = vcombine.low %v380_v46, %v384_v47  ;;  %v363_v61 = vld [vmem:[#allocation2 + $0x200] sm:$0xff]  ;;  %v321_v47 = vld [vmem:[#allocation2 + $0xb0] sm:$0xff] }
 0x226   :  { %1123 = vmatprep.subr.bf16.mxu1 %v2319_v62  ;;  %1165 = vmatpush1.bf16.msra.mxu0 %v2328_v63  ;;  %v367_v62 = vld [vmem:[#allocation2 + $0x220] sm:$0xff]  ;;  %v2393_v63 = vcombine.high %v372_v54, %v376_v55  ;;  %v309_v54 = vld [vmem:[#allocation2 + $0x50] sm:$0xff] }
 0x227   :  { %1166 = vmatprep.subr.bf16.mxu0 %v2321_v4  ;;  %v2390_v4 = vcombine.low %v371_v51, %v375_v52  ;;  %v2383_v6 = vcombine.high %v363_v61, %v367_v62  ;;  %v313_v55 = vld [vmem:[#allocation2 + $0x70] sm:$0xff] }
 0x229   :  { %1124 = vmatpush1.bf16.msra.mxu1 %v2318_v8  ;;  %v357_v8 = vld [vmem:[#allocation2 + $0x1d0] sm:$0xff] }
 0x22a   :  { %1125 = vmatprep.subr.bf16.mxu1 %v2439_v9  ;;  %1167 = vmatpush1.bf16.msra.mxu0 %v2320_v10  ;;  %v361_v9 = vld [vmem:[#allocation2 + $0x1f0] sm:$0xff]  ;;  %v2385_v10 = vcombine.high %v364_v1, %v368_v3 }
 0x22b   :  { %1168 = vmatprep.subr.bf16.mxu0 %v2441_v13  ;;  %v2382_v13 = vcombine.low %v363_v61, %v367_v62  ;;  %v2379_v14 = vcombine.high %v357_v8, %v361_v9  ;;  %v2378_v22 = vcombine.low %v357_v8, %v361_v9  ;;  %v2331_v62 = vcombine.high %v309_v54, %v313_v55  ;;  %v301_v1 = vld [vmem:[#allocation2 + $0x10] sm:$0xff] }
 0x22c   :  { %v305_v3 = vld [vmem:[#allocation2 + $0x30] sm:$0xff]  ;;  %v2330_v8 = vcombine.low %v309_v54, %v313_v55 }
 0x22d   :  { %1126 = vmatpush2.bf16.msra.mxu1 %v2438_v16  ;;  %v349_v16 = vld [vmem:[#allocation2 + $0x190] sm:$0xff]  ;;  %v2323_v9 = vcombine.high %v301_v1, %v305_v3 }
 0x22e   :  { %1127 = vmatprep.subr.bf16.mxu1 %v2431_v17  ;;  %1169 = vmatpush2.bf16.msra.mxu0 %v2440_v18  ;;  %v353_v17 = vld [vmem:[#allocation2 + $0x1b0] sm:$0xff]  ;;  %v2381_v18 = vcombine.high %v358_v11, %v362_v12 }
 0x22f   :  { %1170 = vmatprep.subr.bf16.mxu0 %v2433_v21  ;;  %v354_v21 = vld [vmem:[#allocation2 + $0x1b8] sm:$0xff]  ;;  %v2371_v23 = vcombine.high %v349_v16, %v353_v17  ;;  %v2370_v30 = vcombine.low %v349_v16, %v353_v17  ;;  %v2322_v16 = vcombine.low %v301_v1, %v305_v3  ;;  %v385_v54 = vld [vmem:[#allocation2 + $0x2b0] sm:$0xff] }
 0x230   :  { %v2373_v27 = vcombine.high %v350_v20, %v354_v21  ;;  %v2372_v2 = vcombine.low %v350_v20, %v354_v21  ;;  %v413_v20 = vld [vmem:[#allocation2 + $0x390] sm:$0xff] }
 0x231   :  { %1128 = vmatpush2.bf16.msra.mxu1 %v2430_v24  ;;  %v2380_v24 = vcombine.low %v358_v11, %v362_v12  ;;  %v421_v11 = vld [vmem:[#allocation2 + $0x3d0] sm:$0xff] }
 0x232   :  { %1129 = vmatprep.subr.bf16.mxu1 %v2423_v25  ;;  %1171 = vmatpush2.bf16.msra.mxu0 %v2432_v26  ;;  %v341_v25 = vld [vmem:[#allocation2 + $0x150] sm:$0xff] }
 0x233   :  { %1172 = vmatprep.subr.bf16.mxu0 %v2425_v29  ;;  %v345_v26 = vld [vmem:[#allocation2 + $0x170] sm:$0xff]  ;;  %v346_v29 = vld [vmem:[#allocation2 + $0x178] sm:$0xff] }
 0x234   :  { %v2363_v0 = vcombine.high %v341_v25, %v345_v26  ;;  %v2362_v36 = vcombine.low %v341_v25, %v345_v26  ;;  %v2364_v38 = vcombine.low %v342_v28, %v346_v29  ;;  %v425_v12 = vld [vmem:[#allocation2 + $0x3f0] sm:$0xff] }
 0x235   :  { %1130 = vmatpush2.bf16.msra.mxu1 %v2422_v32  ;;  %v337_v32 = vld [vmem:[#allocation2 + $0x130] sm:$0xff]  ;;  %v2443_v17 = vcombine.high %v421_v11, %v425_v12  ;;  %v2442_v25 = vcombine.low %v421_v11, %v425_v12 }
 0x236   :  { %1131 = vmatprep.subr.bf16.mxu1 %v2415_v33  ;;  %1173 = vmatpush2.bf16.msra.mxu0 %v2424_v34  ;;  %v2365_v33 = vcombine.high %v342_v28, %v346_v29  ;;  %v334_v34 = vld [vmem:[#allocation2 + $0x118] sm:$0xff]  ;;  %v2354_v44 = vcombine.low %v333_v31, %v337_v32  ;;  %v417_v21 = vld [vmem:[#allocation2 + $0x3b0] sm:$0xff] }
 0x237   :  { %1174 = vmatprep.subr.bf16.mxu0 %v2417_v37  ;;  %v2355_v37 = vcombine.high %v333_v31, %v337_v32  ;;  %v2356_v46 = vcombine.low %v334_v34, %v338_v35  ;;  %v2435_v26 = vcombine.high %v413_v20, %v417_v21  ;;  %v405_v28 = vld [vmem:[#allocation2 + $0x350] sm:$0xff]  ;;  %v2434_v31 = vcombine.low %v413_v20, %v417_v21 }
 0x238   :  { %v409_v29 = vld [vmem:[#allocation2 + $0x370] sm:$0xff] }
 0x239   :  { %1132 = vmatpush2.bf16.msra.mxu1 %v2414_v40  ;;  %v329_v40 = vld [vmem:[#allocation2 + $0xf0] sm:$0xff]  ;;  %v2427_v32 = vcombine.high %v405_v28, %v409_v29 }
 0x23a   :  { %1133 = vmatprep.subr.bf16.mxu1 %v2407_v41  ;;  %1175 = vmatpush2.bf16.msra.mxu0 %v2416_v42  ;;  %v2357_v41 = vcombine.high %v334_v34, %v338_v35  ;;  %v326_v42 = vld [vmem:[#allocation2 + $0xd8] sm:$0xff]  ;;  %v2346_v51 = vcombine.low %v325_v39, %v329_v40  ;;  %v397_v34 = vld [vmem:[#allocation2 + $0x310] sm:$0xff] }
 0x23b   :  { %1176 = vmatprep.subr.bf16.mxu0 %v2409_v45  ;;  %v2347_v45 = vcombine.high %v325_v39, %v329_v40  ;;  %v401_v35 = vld [vmem:[#allocation2 + $0x330] sm:$0xff]  ;;  %v2426_v40 = vcombine.low %v405_v28, %v409_v29 }
 0x23d   :  { %1134 = vmatpush2.bf16.msra.mxu1 %v2406_v48  ;;  %v2349_v48 = vcombine.high %v326_v42, %v330_v43 }
 0x23e   :  { %1135 = vmatprep.subr.bf16.mxu1 %v2399_v49  ;;  %1177 = vmatpush2.bf16.msra.mxu0 %v2408_v50  ;;  %v318_v49 = vld [vmem:[#allocation2 + $0x98] sm:$0xff] }
 0x23f   :  { %1178 = vmatprep.subr.bf16.mxu0 %v2401_v53  ;;  %v322_v50 = vld [vmem:[#allocation2 + $0xb8] sm:$0xff]  ;;  %v2348_v53 = vcombine.low %v326_v42, %v330_v43  ;;  %v2419_v42 = vcombine.high %v397_v34, %v401_v35 }
 0x241   :  { %1136 = vmatpush2.bf16.msra.mxu1 %v2398_v57  ;;  %v2341_v57 = vcombine.high %v318_v49, %v322_v50 }
 0x242   :  { %1137 = vmatprep.subr.bf16.mxu1 %v2391_v58  ;;  %1179 = vmatpush2.bf16.msra.mxu0 %v2400_v59  ;;  %v310_v58 = vld [vmem:[#allocation2 + $0x58] sm:$0xff] }
 0x243   :  { %1180 = vmatprep.subr.bf16.mxu0 %v2393_v63  ;;  %v314_v59 = vld [vmem:[#allocation2 + $0x78] sm:$0xff]  ;;  %v2340_v63 = vcombine.low %v318_v49, %v322_v50  ;;  %v2418_v50 = vcombine.low %v397_v34, %v401_v35  ;;  %v2817_v35 = vmov 0.0  }
 0x245   :  { %1138 = vmatpush2.bf16.msra.mxu1 %v2390_v4  ;;  %v2333_v4 = vcombine.high %v310_v58, %v314_v59 }
 0x246   :  { %1139 = vmatprep.subr.bf16.mxu1 %v2383_v6  ;;  %1181 = vmatpush2.bf16.msra.mxu0 %v2392_v7  ;;  %v302_v6 = vld [vmem:[#allocation2 + $0x18] sm:$0xff] }
 0x247   :  { %1182 = vmatprep.subr.bf16.mxu0 %v2385_v10  ;;  %v306_v7 = vld [vmem:[#allocation2 + $0x38] sm:$0xff]  ;;  %v2332_v10 = vcombine.low %v310_v58, %v314_v59 }
 0x249   :  { %1140 = vmatpush2.bf16.msra.mxu1 %v2382_v13  ;;  %v2325_v13 = vcombine.high %v302_v6, %v306_v7 }
 0x24a   :  { %1195 = vmatprep.subr.bf16.mxu1 %v2379_v14  ;;  %1183 = vmatpush2.bf16.msra.mxu0 %v2384_v15  ;;  %v422_v14 = vld [vmem:[#allocation2 + $0x3d8] sm:$0xff] }
 0x24b   :  { %1238 = vmatprep.subr.bf16.mxu0 %v2381_v18  ;;  %v426_v15 = vld [vmem:[#allocation2 + $0x3f8] sm:$0xff]  ;;  %v2324_v18 = vcombine.low %v302_v6, %v306_v7  ;;  %v377_v6 = vld [vmem:[#allocation2 + $0x270] sm:$0xff] }
 0x24c   :  { %1142 = vmatmul.mubr.bf16.vlgmr.msra.gmra.mxu1 %v2959_v19 }
 0x24d   :  { %1196 = vmatpush1.bf16.msra.mxu1 %v2378_v22  ;;  %1185 = vmatmul.mubr.bf16.vlgmr.msra.gmra.mxu0 %v2959_v19  ;;  %v2445_v22 = vcombine.high %v422_v14, %v426_v15 }
 0x24e   :  { %1197 = vmatprep.subr.bf16.mxu1 %v2371_v23  ;;  %1239 = vmatpush1.bf16.msra.mxu0 %v2380_v24  ;;  %v414_v23 = vld [vmem:[#allocation2 + $0x398] sm:$0xff] }
 0x24f   :  { %1240 = vmatprep.subr.bf16.mxu0 %v2373_v27  ;;  %1227 = vmatprep.mubr.bf16.mxu1 %v2891_v5  ;;  %v418_v24 = vld [vmem:[#allocation2 + $0x3b8] sm:$0xff]  ;;  %v2444_v27 = vcombine.low %v422_v14, %v426_v15  ;;  %v369_v14 = vld [vmem:[#allocation2 + $0x230] sm:$0xff] }
 0x250   :  { %1270 = vmatprep.mubr.bf16.mxu0 %v2891_v5  ;;  %v317_v5 = vld [vmem:[#allocation2 + $0x90] sm:$0xff] }
 0x251   :  { %1198 = vmatpush1.bf16.msra.mxu1 %v2370_v30  ;;  %v2339_v52 = vcombine.high %v317_v5, %v321_v47  ;;  %v2338_v61 = vcombine.low %v317_v5, %v321_v47  ;;  %v2437_v30 = vcombine.high %v414_v23, %v418_v24  ;;  %v390_v47 = vld [vmem:[#allocation2 + $0x2d8] sm:$0xff] }
 0x252   :  { %1199 = vmatprep.subr.bf16.mxu1 %v2363_v0  ;;  %1241 = vmatpush1.bf16.msra.mxu0 %v2372_v2  ;;  %v406_v0 = vld [vmem:[#allocation2 + $0x358] sm:$0xff] }
 0x253   :  { %1242 = vmatprep.subr.bf16.mxu0 %v2365_v33  ;;  %v410_v2 = vld [vmem:[#allocation2 + $0x378] sm:$0xff]  ;;  %v2436_v33 = vcombine.low %v414_v23, %v418_v24 }
 0x254   :  { %v2428_v43 = vcombine.low %v406_v0, %v410_v2  ;;  %v370_v23 = vld [vmem:[#allocation2 + $0x238] sm:$0xff] }
 0x255   :  { %1200 = vmatpush1.bf16.msra.mxu1 %v2362_v36  ;;  %v2429_v36 = vcombine.high %v406_v0, %v410_v2  ;;  %v1298_v2 = vld [vmem:[%s3072_s7] sm:$0xff] }
 0x256   :  { %1201 = vmatprep.subr.bf16.mxu1 %v2355_v37  ;;  %1243 = vmatpush1.bf16.msra.mxu0 %v2364_v38  ;;  %v398_v37 = vld [vmem:[#allocation2 + $0x318] sm:$0xff] }
 0x257   :  { %1244 = vmatprep.subr.bf16.mxu0 %v2357_v41  ;;  %v402_v38 = vld [vmem:[#allocation2 + $0x338] sm:$0xff] }
 0x259   :  { %1202 = vmatpush1.bf16.msra.mxu1 %v2354_v44  ;;  %v389_v44 = vld [vmem:[#allocation2 + $0x2d0] sm:$0xff] }
 0x25a   :  { %1203 = vmatprep.subr.bf16.mxu1 %v2347_v45  ;;  %1245 = vmatpush1.bf16.msra.mxu0 %v2356_v46  ;;  %v393_v45 = vld [vmem:[#allocation2 + $0x2f0] sm:$0xff]  ;;  %v2421_v46 = vcombine.high %v398_v37, %v402_v38 }
 0x25b   :  { %1246 = vmatprep.subr.bf16.mxu0 %v2349_v48  ;;  %v394_v48 = vld [vmem:[#allocation2 + $0x2f8] sm:$0xff]  ;;  %v2410_v58 = vcombine.low %v389_v44, %v393_v45 }
 0x25c   :  { %v2413_v55 = vcombine.high %v390_v47, %v394_v48 }
 0x25d   :  { %1204 = vmatpush1.bf16.msra.mxu1 %v2346_v51 }
 0x25e   :  { %1205 = vmatprep.subr.bf16.mxu1 %v2339_v52  ;;  %1247 = vmatpush1.bf16.msra.mxu0 %v2348_v53  ;;  %v2420_v52 = vcombine.low %v398_v37, %v402_v38  ;;  %v381_v53 = vld [vmem:[#allocation2 + $0x290] sm:$0xff]  ;;  %v1302_v37 = vcombine.high %v1298_v2, %v1298_v2  ;;  %v2818_v38 = vmov 0  }
 0x25f   :  { %1248 = vmatprep.subr.bf16.mxu0 %v2341_v57  ;;  %v2403_v59 = vcombine.high %v381_v53, %v385_v54 }
 0x261   :  { %1206 = vmatpush1.bf16.msra.mxu1 %v2338_v61  ;;  %v2412_v61 = vcombine.low %v390_v47, %v394_v48 }
 0x262   :  { %1207 = vmatprep.subr.bf16.mxu1 %v2331_v62  ;;  %1249 = vmatpush1.bf16.msra.mxu0 %v2340_v63  ;;  %v2402_v62 = vcombine.low %v381_v53, %v385_v54  ;;  %v2679_v54 = vld [vmem:[#allocation5 + $0xb0] sm:$0xff]  }
 0x263   :  { %1250 = vmatprep.subr.bf16.mxu0 %v2333_v4  ;;  %v373_v4 = vld [vmem:[#allocation2 + $0x250] sm:$0xff] }
 0x264   :  { %v2395_v7 = vcombine.high %v373_v4, %v377_v6 }
 0x265   :  { %1208 = vmatpush1.bf16.msra.mxu1 %v2330_v8  ;;  %v2394_v8 = vcombine.low %v373_v4, %v377_v6  ;;  %v2672_v4 = vld [vmem:[#allocation5 + $0x68] sm:$0xff]  }
 0x266   :  { %1209 = vmatprep.subr.bf16.mxu1 %v2323_v9  ;;  %1251 = vmatpush1.bf16.msra.mxu0 %v2332_v10  ;;  %v382_v9 = vld [vmem:[#allocation2 + $0x298] sm:$0xff]  ;;  %v2674_v6 = vld [vmem:[#allocation5 + $0x28] sm:$0xff]  }
 0x267   :  { %1252 = vmatprep.subr.bf16.mxu0 %v2325_v13  ;;  %v386_v10 = vld [vmem:[#allocation2 + $0x2b8] sm:$0xff]  ;;  %v365_v13 = vld [vmem:[#allocation2 + $0x210] sm:$0xff] }
 0x268   :  { %v2405_v11 = vcombine.high %v382_v9, %v386_v10  ;;  %v2404_v12 = vcombine.low %v382_v9, %v386_v10  ;;  %v2387_v15 = vcombine.high %v365_v13, %v369_v14  ;;  %v2680_v9 = vld [vmem:[#allocation5 + $0x58] sm:$0xff]  }
 0x269   :  { %1210 = vmatpush1.bf16.msra.mxu1 %v2322_v16  ;;  %v2386_v16 = vcombine.low %v365_v13, %v369_v14  ;;  %v2682_v10 = vld [vmem:[#allocation5 + $0x18] sm:$0xff]   ;;  %v2687_v13 = vld [vmem:[#allocation5 + $0xa0] sm:$0xff]   ;;  %v2688_v14 = vld [vmem:[#allocation5 + $0x48] sm:$0xff]  }
 0x26a   :  { %1211 = vmatprep.subr.bf16.mxu1 %v2443_v17  ;;  %1253 = vmatpush1.bf16.msra.mxu0 %v2324_v18  ;;  %v374_v17 = vld [vmem:[#allocation2 + $0x258] sm:$0xff] }
 0x26b   :  { %1254 = vmatprep.subr.bf16.mxu0 %v2445_v22  ;;  %v378_v18 = vld [vmem:[#allocation2 + $0x278] sm:$0xff] }
 0x26c   :  { %v2397_v20 = vcombine.high %v374_v17, %v378_v18  ;;  %v2396_v21 = vcombine.low %v374_v17, %v378_v18  ;;  %v366_v22 = vld [vmem:[#allocation2 + $0x218] sm:$0xff]  ;;  %v2692_v18 = vld [vmem:[#allocation5 + $0x40] sm:$0xff]  }
 0x26d   :  { %1212 = vmatpush2.bf16.msra.mxu1 %v2442_v25  ;;  %v2389_v24 = vcombine.high %v366_v22, %v370_v23  ;;  %v429_v25 = vlaneseq  ;;  %v2388_v28 = vcombine.low %v366_v22, %v370_v23  ;;  %v2691_v17 = vld [vmem:[#allocation5 + $0x98] sm:$0xff]   ;;  %v2695_v22 = vld [vmem:[#allocation5 + $0x90] sm:$0xff]   ;;  %v2696_v23 = vld [vmem:[#allocation5 + $0xc8] sm:$0xff]  }
 0x26e   :  { %1213 = vmatprep.subr.bf16.mxu1 %v2435_v26  ;;  %1255 = vmatpush2.bf16.msra.mxu0 %v2444_v27  ;;  %v2816_v26 = vmov 1983009808  }
 0x26f   :  { %1256 = vmatprep.subr.bf16.mxu0 %v2437_v30  ;;  %v1304_v27 = vunpack.c.l.s4 %v2816_v26  ;;  %v2976_v29 = vshrl.u32 %v429_v25, 7  ;;  %v2698_v25 = vld [vmem:[#allocation5 + $0x88] sm:$0xff]   ;;  %v2700_v26 = vld [vmem:[#allocation5 + $0xc0] sm:$0xff]  }
 0x271   :  { %1214 = vmatpush2.bf16.msra.mxu1 %v2434_v31  ;;  %v1305_v30 = vunpack.c.0.s8 %v1304_v27  ;;  %v2702_v27 = vld [vmem:[#allocation5 + $0x80] sm:$0xff]  }
 0x272   :  { %1215 = vmatprep.subr.bf16.mxu1 %v2427_v32  ;;  %1257 = vmatpush2.bf16.msra.mxu0 %v2436_v33  ;;  %v1688_v33 = vld [vmem:[%s3071_s6] sm:$0x3] }
 0x273   :  { %1258 = vmatprep.subr.bf16.mxu0 %v2429_v36  ;;  %v1308_v0 = vsub.s32 %v1305_v30, %v2976_v29  ;;  %v1690_v36 = vsel %vm1339_vm1, %v1688_v33, 0 }
 0x275   :  { %1216 = vmatpush2.bf16.msra.mxu1 %v2426_v40  ;;  %v1309_v31 = vrot.slane %v1298_v2, %v1308_v0  ;;  %v2673_v40 = vld [vmem:[#allocation5 + $0xf8] sm:$0xff]  }
 0x276   :  { %1217 = vmatprep.subr.bf16.mxu1 %v2419_v42  ;;  %1259 = vmatpush2.bf16.msra.mxu0 %v2428_v43  ;;  %v1299_v43 = vld [vmem:[%s3072_s7 + $0x8] sm:$0xff] }
 0x277   :  { %1260 = vmatprep.subr.bf16.mxu0 %v2421_v46  ;;  %v1317_v32 = vcombine.high %v1309_v31, %v1309_v31  ;;  %v1341_v34 = vsel %vm1339_vm1, %v1309_v31, 0 }
 0x279   :  { %1218 = vmatpush2.bf16.msra.mxu1 %v2418_v50 }
 0x27a   :  { %1261 = vmatpush2.bf16.msra.mxu0 %v2420_v52  ;;  %v2677_v52 = vld [vmem:[#allocation5 + $0xf0] sm:$0xff]  }
 0x27b   :  { %1262 = vmatprep.subr.bf16.mxu0 %v2413_v55  ;;  %v2681_v55 = vld [vmem:[#allocation5 + $0xe8] sm:$0xff]  }
 0x27e   :  { %1263 = vmatpush2.bf16.msra.mxu0 %v2412_v61  ;;  %v2685_v61 = vld [vmem:[#allocation5 + $0xe0] sm:$0xff]  }
 0x27f   :  { %1264 = vmatprep.subr.bf16.mxu0 %v2405_v11  ;;  %v2684_v11 = vld [vmem:[#allocation5 + $0x50] sm:$0xff]  }
 0x282   :  { %1265 = vmatpush2.bf16.msra.mxu0 %v2404_v12  ;;  %v2686_v12 = vld [vmem:[#allocation5 + $0x10] sm:$0xff]  }
 0x283   :  { %1266 = vmatprep.subr.bf16.mxu0 %v2397_v20  ;;  %v2693_v20 = vld [vmem:[#allocation5 + $0xd0] sm:$0xff]  }
 0x286   :  { %1267 = vmatpush2.bf16.msra.mxu0 %v2396_v21  ;;  %v2694_v21 = vld [vmem:[#allocation5] sm:$0xff]  }
 0x287   :  { %1268 = vmatprep.subr.bf16.mxu0 %v2389_v24  ;;  %v2697_v24 = vld [vmem:[#allocation5 + $0x178] sm:$0xff]  }
 0x28a   :  { %1269 = vmatpush2.bf16.msra.mxu0 %v2388_v28  ;;  %v2705_v28 = vld [vmem:[#allocation5 + $0x1f8] sm:$0xff]  }
 0x28b   :  { %2631 = vmatprep.subr.bf16.mxu0 %v2817_v35 }
 0x28d   :  { %1271 = vmatmul.mubr.bf16.vlgmr.msra.gmra.mxu0 %v2959_v19 }
 0x28e   :  { %2632 = vmatpush3.bf16.msra.mxu0 %v1690_v36  ;;  %2633 = vmatprep.mubr.msk.bf16.mxu0 %vm2819_vm2, %v2817_v35 }
 0x28f   :  { %2565 = vmatprep.subr.bf16.mxu0 %v2673_v40 }
 0x2a8   :  { %v277_v39 = vpop.xlane.xlu0 %276 }
 0x2a9   :  { %v281_v41 = vsub.f32 %v2949_v56, %v277_v39  ;;  %v2411_v56 = vcombine.high %v389_v44, %v393_v45  ;;  %v1326_v45 = vrot.slane %v1299_v43, %v1308_v0 }
 0x2ab   :  { %v283_v5 = vmul.f32 1.442695, %v281_v41  ;;  %1219 = vmatprep.subr.bf16.mxu1 %v2411_v56  ;;  %v1334_v50 = vcombine.high %v1326_v45, %v1326_v45  ;;  %v2675_v56 = vld [vmem:[#allocation5 + $0xb8] sm:$0xff]  }
 0x2ac   :  { %v280_v49 = vpop.xlane.xlu1 %279  ;;  %1220 = vmatpush2.bf16.msra.mxu1 %v2410_v58 }
 0x2ad   :  { %2736 = vpow2.f32 %v283_v5  ;;  %v282_v51 = vsub.f32 %v2953_v60, %v280_v49  ;;  %1221 = vmatprep.subr.bf16.mxu1 %v2403_v59  ;;  %v2683_v59 = vld [vmem:[#allocation5 + $0xa8] sm:$0xff]  }
 0x2af   :  { %v285_v57 = vmul.f32 1.442695, %v282_v51  ;;  %v1319_v51 = vcombine.high %v1299_v43, %v1299_v43 }
 0x2b0   :  { %1222 = vmatpush2.bf16.msra.mxu1 %v2402_v62 }
 0x2b1   :  { %2738 = vpow2.f32 %v285_v57  ;;  %1223 = vmatprep.subr.bf16.mxu1 %v2395_v7  ;;  %v1333_v53 = vrot.slane %v1319_v51, %v1308_v0  ;;  %v1353_v57 = vsel %vm1339_vm1, %v1326_v45, 0  ;;  %v2676_v7 = vld [vmem:[#allocation5 + $0x60] sm:$0xff]  }
 0x2b3   :  { %v1335_v58 = vcombine.high %v1333_v53, %v1333_v53  ;;  %v1359_v62 = vsel %vm1339_vm1, %v1333_v53, 0 }
 0x2b4   :  { %1224 = vmatpush2.bf16.msra.mxu1 %v2394_v8  ;;  %v2678_v8 = vld [vmem:[#allocation5 + $0x20] sm:$0xff]  }
 0x2b5   :  { %1225 = vmatprep.subr.bf16.mxu1 %v2387_v15  ;;  %v2689_v15 = vld [vmem:[#allocation5 + $0xd8] sm:$0xff]  }
 0x2b8   :  { %1226 = vmatpush2.bf16.msra.mxu1 %v2386_v16  ;;  %v2690_v16 = vld [vmem:[#allocation5 + $0x8] sm:$0xff]  }
 0x2b9   :  { %2446 = vmatprep.subr.msk.bf16.mxu1 %vm1339_vm1, %v1317_v32 }
 0x2ba   :  { %v2967_v60 = vpop.eup %2736 }
 0x2bb   :  { %v287_v63 = vsel %vm274_vm0, %v2967_v60, 0.0  ;;  %1228 = vmatmul.mubr.bf16.vlgmr.msra.gmra.mxu1 %v2959_v19  ;;  %v1316_v19 = vrot.slane %v1302_v37, %v1308_v0 }
 0x2bc   :  { %288 = vadd.xlane.f32.xlu0 %v287_v63  ;;  %1379 = vmatpush1.bf16.msra.mxu1 %v1341_v34  ;;  %v2669_v63 = vld [vmem:[#allocation5 + $0x38] sm:$0xff]  }
 0x2bd   :  { %1396 = vmatprep.mubr.bf16.mxu1 %v2818_v38  ;;  %v1318_v39 = vcombine.high %v1316_v19, %v1316_v19  ;;  %v1347_v49 = vsel %vm1339_vm1, %v1316_v19, 0 }
 0x2be   :  { %v2971_v1 = vpop.eup %2738 }
 0x2bf   :  { %v290_v3 = vsel %vm274_vm0, %v2971_v1, 0.0  ;;  %2448 = vmatprep.subr.msk.bf16.mxu1 %vm1339_vm1, %v1318_v39  ;;  %v431_v39 = vsub.s32 0, %v2976_v29 }
 0x2c0   :  { %291 = vadd.xlane.f32.xlu1 %v290_v3  ;;  %v2671_v3 = vld [vmem:[#allocation5 + $0x30] sm:$0xff]  }
 0x30c   :  { %v1143_v0 = vpop.f32.mrf.mxu1 }
 0x30d   :  { %v1186_v30 = vpop.f32.mrf.mxu0 }
 0x30e   :  { %v1145_v31 = vpop.f32.mrf.mxu1 }
 0x30f   :  { %v1188_v2 = vpop.f32.mrf.mxu0 }
 0x310   :  { %v1147_v33 = vpop.f32.mrf.mxu1 }
 0x311   :  { %v1190_v32 = vpop.f32.mrf.mxu0 }
 0x312   :  { %v1149_v35 = vpop.f32.mrf.mxu1 }
 0x313   :  { %v1192_v34 = vpop.f32.mrf.mxu0 }
 0x345   :  { %v289_v41 = vpop.xlane.xlu0 %288 }
 0x346   :  { %2740 = vrcp.f32 %v289_v41  ;;  %v3019_v41 = vld [vmem:[%s3069_s4] sm:$0xff]  ;;  %s2820_s4 = smov [#allocation7]  }
 0x347   :  { %s2288_s15 = sshll.u32 %s2820_s4, 4  ;;  %s2289_s15 = int_to_ptr.vmem [resolvable:$true] %s2288_s15 }
 0x348   :  { %s2784_s16 = scalar_lea.vmem %s2289_s15, 256  ;;  %p2789_p11 = scmp.lt.s32.totalorder %s2289_s15, %s2289_s15 }
 0x349   :  { %v292_v42 = vpop.xlane.xlu1 %291  ;;  %p2785_p10 = scmp.ne.s32.totalorder %s2289_s15, %s2784_s16  ;;  %p2790_p12 = scmp.lt.s32.totalorder %s2784_s16, %s2784_s16 }
 0x34a   :  { %2742 = vrcp.f32 %v292_v42  ;;  %v435_v42 = vsub.s32 1, %v2976_v29 }
 0x34b   :  { %p2791_p13 = por %p2790_p12, %p2789_p11 }
 0x34d   :  { %v3005_v36 = vpop.f32.mrf.mxu0  ;;  %p2792_p0 = pnand %p2791_p13, %p2785_p10 }
 0x353   :  { %v2741_v44 = vpop.eup %2740 }
 0x354   :  { %v295_v5 = vmul.f32 %v2741_v44, %v2967_v60  ;;  %v2668_v60 = vld [vmem:[#allocation5 + $0x78] sm:$0xff]   ;;  %v432_v44 = vrot.slane %v3019_v41, %v431_v39 }
 0x356   :  { %v1144_v53 = vadd.f32 %v1143_v0, %v432_v44 }
 0x357   :  { %v2743_v46 = vpop.eup %2742 }
 0x358   :  { %v296_v47 = vmul.f32 %v2743_v46, %v2971_v1  ;;  %v2670_v1 = vld [vmem:[#allocation5 + $0x70] sm:$0xff]   ;;  %v436_v46 = vrot.slane %v3019_v41, %v435_v42 }
 0x35a   :  { %v1297_v48 = vpack.c.bf16 %v296_v47, %v295_v5  ;;  %v1148_v47 = vadd.f32 %v1147_v33, %v432_v44  ;;  %v1146_v51 = vadd.f32 %v1145_v31, %v436_v46  ;;  %v2704_v31 = vld [vmem:[#allocation5 + $0x168] sm:$0xff]  }
 0x35c   :  { %2447 = vmatmul.mubr.msk.bf16.vlgmr.msra.gmra.mxu1 %vm274_vm0, %v1297_v48  ;;  %2634 = vmatmul.mubr.msk.bf16.vlgmr.msra.gmra.mxu0 %vm274_vm0, %v1297_v48 }
 0x35d   :  { %1422 = vmatpush1.bf16.msra.mxu1 %v1347_v49  ;;  %1439 = vmatprep.mubr.bf16.mxu1 %v2818_v38 }
 0x35e   :  { %2450 = vmatprep.subr.msk.bf16.mxu1 %vm1339_vm1, %v1334_v50  ;;  %2566 = vmatpush3.bf16.msra.mxu0 %v2675_v56  ;;  %v1150_v56 = vadd.f32 %v1149_v35, %v436_v46  ;;  %v2706_v46 = vld [vmem:[#allocation5 + $0x128] sm:$0xff]  }
 0x35f   :  { %2567 = vmatprep.subr.bf16.mxu0 %v2677_v52  ;;  %v443_v52 = vsub.s32 3, %v2976_v29 }
 0x362   :  { %2568 = vmatpush3.bf16.msra.mxu0 %v2679_v54 }
 0x363   :  { %2569 = vmatprep.subr.bf16.mxu0 %v2681_v55 }
 0x364   :  { %2449 = vmatmul.mubr.msk.bf16.vlgmr.msra.gmra.mxu1 %vm274_vm0, %v1297_v48 }
 0x365   :  { %1465 = vmatpush1.bf16.msra.mxu1 %v1353_v57  ;;  %1482 = vmatprep.mubr.bf16.mxu1 %v2818_v38  ;;  %v1289_v57 = vmax.f32 %v1148_v47, 0.0  ;;  %v2707_v47 = vld [vmem:[#allocation5 + $0x1b8] sm:$0xff]  }
 0x366   :  { %2452 = vmatprep.subr.msk.bf16.mxu1 %vm1339_vm1, %v1335_v58  ;;  %2570 = vmatpush3.bf16.msra.mxu0 %v2683_v59 }
 0x367   :  { %2571 = vmatprep.subr.bf16.mxu0 %v2685_v61 }
 0x36a   :  { %2572 = vmatpush3.bf16.msra.mxu0 %v2687_v13 }
 0x36b   :  { %2573 = vmatprep.subr.bf16.mxu0 %v2689_v15 }
 0x36c   :  { %2451 = vmatmul.mubr.msk.bf16.vlgmr.msra.gmra.mxu1 %vm274_vm0, %v1297_v48 }
 0x36d   :  { %1508 = vmatpush1.bf16.msra.mxu1 %v1359_v62  ;;  %1525 = vmatprep.mubr.bf16.mxu1 %v2818_v38  ;;  %v3009_v38 = vpop.f32.mrf.mxu0  ;;  %v1282_v62 = vmax.f32 %v1146_v51, 0.0  ;;  %v2708_v51 = vld [vmem:[#allocation5 + $0x160] sm:$0xff]  }
 0x36e   :  { %2543 = vmatprep.subr.bf16.mxu1 %v2668_v60  ;;  %2574 = vmatpush3.bf16.msra.mxu0 %v2691_v17  ;;  %v1290_v60 = vmax.f32 %v1150_v56, 0.0  ;;  %v2709_v56 = vld [vmem:[#allocation5 + $0x1f0] sm:$0xff]  }
 0x36f   :  { %2575 = vmatprep.subr.bf16.mxu0 %v2693_v20  ;;  %v3014_v40 = vpop.f32.mrf.mxu0 }
 0x371   :  { %v3025_v45 = vpop.f32.mrf.mxu0 }
 0x372   :  { %2576 = vmatpush3.bf16.msra.mxu0 %v2695_v22 }
 0x373   :  { %2577 = vmatprep.subr.bf16.mxu0 %v2696_v23 }
 0x374   :  { %2453 = vmatmul.mubr.msk.bf16.vlgmr.msra.gmra.mxu1 %vm274_vm0, %v1297_v48  ;;  %v439_v48 = vsub.s32 2, %v2976_v29 }
 0x375   :  { %2544 = vmatpush3.bf16.msra.mxu1 %v2669_v63  ;;  %v444_v63 = vrot.slane %v3019_v41, %v443_v52 }
 0x376   :  { %2545 = vmatprep.subr.bf16.mxu1 %v2670_v1  ;;  %2578 = vmatpush3.bf16.msra.mxu0 %v2698_v25  ;;  %v440_v58 = vrot.slane %v3019_v41, %v439_v48  ;;  %v1281_v1 = vmax.f32 %v1144_v53, 0.0 }
 0x377   :  { %2579 = vmatprep.subr.bf16.mxu0 %v2700_v26  ;;  %v1193_v13 = vadd.f32 %v1192_v34, %v444_v63 }
 0x378   :  { %v1187_v17 = vadd.f32 %v1186_v30, %v440_v58  ;;  %v459_v30 = vsub.s32 7, %v2976_v29 }
 0x379   :  { %2546 = vmatpush3.bf16.msra.mxu1 %v2671_v3  ;;  %v1292_v25 = vmax.f32 %v1193_v13, 0.0 }
 0x37a   :  { %2547 = vmatprep.subr.bf16.mxu1 %v2672_v4  ;;  %2580 = vmatpush3.bf16.msra.mxu0 %v2702_v27  ;;  %v2703_v27 = vld [vmem:[#allocation5 + $0x130] sm:$0xff]   ;;  %v460_v52 = vrot.slane %v3019_v41, %v459_v30 }
 0x37b   :  { %2609 = vmatprep.subr.bf16.mxu0 %v2705_v28  ;;  %v3007_v37 = vpop.f32.mrf.mxu1  ;;  %v1283_v28 = vmax.f32 %v1187_v17, 0.0  ;;  %v2720_v17 = vld [vmem:[#allocation5 + $0x148] sm:$0xff]   ;;  %v2727_v30 = vld [vmem:[#allocation5 + $0x190] sm:$0xff]  }
 0x37d   :  { %2548 = vmatpush3.bf16.msra.mxu1 %v2674_v6  ;;  %v3011_v19 = vpop.f32.mrf.mxu1 }
 0x37e   :  { %2549 = vmatprep.subr.bf16.mxu1 %v2676_v7 }
 0x37f   :  { %v3022_v43 = vpop.f32.mrf.mxu1 }
 0x381   :  { %2550 = vmatpush3.bf16.msra.mxu1 %v2678_v8  ;;  %v1235_v5 = vpop.f32.mrf.mxu1 }
 0x382   :  { %2551 = vmatprep.subr.bf16.mxu1 %v2680_v9  ;;  %v1191_v9 = vadd.f32 %v1190_v32, %v440_v58  ;;  %v2712_v58 = vld [vmem:[#allocation5 + $0x158] sm:$0xff]  }
 0x384   :  { %v1291_v22 = vmax.f32 %v1191_v9, 0.0 }
 0x385   :  { %2552 = vmatpush3.bf16.msra.mxu1 %v2682_v10 }
 0x386   :  { %2553 = vmatprep.subr.bf16.mxu1 %v2684_v11 }
 0x389   :  { %2554 = vmatpush3.bf16.msra.mxu1 %v2686_v12  ;;  %v1189_v12 = vadd.f32 %v1188_v2, %v444_v63 }
 0x38a   :  { %2555 = vmatprep.subr.bf16.mxu1 %v2688_v14  ;;  %v451_v14 = vsub.s32 5, %v2976_v29 }
 0x38c   :  { %v452_v26 = vrot.slane %v3019_v41, %v451_v14  ;;  %v2718_v14 = vld [vmem:[#allocation5 + $0x110] sm:$0xff]  }
 0x38d   :  { %2556 = vmatpush3.bf16.msra.mxu1 %v2690_v16  ;;  %v2699_v16 = vld [vmem:[#allocation5 + $0x138] sm:$0xff]  }
 0x38e   :  { %2557 = vmatprep.subr.bf16.mxu1 %v2692_v18  ;;  %v1232_v39 = vadd.f32 %v3011_v19, %v452_v26  ;;  %v1236_v42 = vadd.f32 %v1235_v5, %v452_v26  ;;  %v2710_v19 = vld [vmem:[#allocation5 + $0x120] sm:$0xff]   ;;  %v2711_v5 = vld [vmem:[#allocation5 + $0x1b0] sm:$0xff]   ;;  %v2723_v26 = vld [vmem:[#allocation5 + $0x198] sm:$0xff]  }
 0x391   :  { %2558 = vmatpush3.bf16.msra.mxu1 %v2694_v21  ;;  %v2701_v21 = vld [vmem:[#allocation5 + $0x170] sm:$0xff]  }
 0x392   :  { %2587 = vmatprep.subr.bf16.mxu1 %v2697_v24  ;;  %v1284_v24 = vmax.f32 %v1189_v12, 0.0 }
 0x41c   :  { %v1398_v49 = vpop.f32.mrf.mxu1  ;;  %v3029_v50 = vpop.f32.mrf.mxu0 }
 0x41d   :  { %v1536_v10 = vmul.f32 %v1398_v49, %v1281_v1 }
 0x41e   :  { %v1400_v54 = vpop.f32.mrf.mxu1  ;;  %v2635_v55 = vpop.f32.mrf.mxu0 }
 0x41f   :  { %v1537_v7 = vmul.f32 %v1400_v54, %v1282_v62  ;;  %v1286_v54 = vmax.f32 %v1232_v39, 0.0  ;;  %v1294_v55 = vmax.f32 %v1236_v42, 0.0  ;;  %v1275_v62 = vadd.f32 %v3009_v38, %v460_v52  ;;  %v2729_v42 = vld [vmem:[#allocation5 + $0x188] sm:$0xff]  }
 0x420   :  { %v1402_v59 = vpop.f32.mrf.mxu1  ;;  %v3033_v61 = vpop.f32.mrf.mxu0 }
 0x421   :  { %v1544_v3 = vmul.f32 %v1402_v59, %v1289_v57  ;;  %v2713_v59 = vld [vmem:[#allocation5 + $0x1e8] sm:$0xff]   ;;  %v1288_v12 = vmax.f32 %v1275_v62, 0.0 }
 0x422   :  { %v1404_v4 = vpop.f32.mrf.mxu1  ;;  %v2636_v6 = vpop.f32.mrf.mxu0 }
 0x423   :  { %v1545_v8 = vmul.f32 %v1404_v4, %v1290_v60  ;;  %v1552_v18 = vpack.c.bf16 %v1544_v3, %v1536_v10  ;;  %v1279_v60 = vadd.f32 %v3025_v45, %v460_v52  ;;  %v447_v3 = vsub.s32 4, %v2976_v29  ;;  %v2716_v10 = vld [vmem:[#allocation5 + $0x150] sm:$0xff]  }
 0x424   :  { %v1441_v11 = vpop.f32.mrf.mxu1 }
 0x425   :  { %v1553_v15 = vpack.c.bf16 %v1545_v8, %v1537_v7  ;;  %v1538_v34 = vmul.f32 %v1441_v11, %v1283_v28  ;;  %v2714_v7 = vld [vmem:[#allocation5 + $0x118] sm:$0xff]   ;;  %v2715_v8 = vld [vmem:[#allocation5 + $0x1a8] sm:$0xff]   ;;  %v2717_v11 = vld [vmem:[#allocation5 + $0x1e0] sm:$0xff]   ;;  %v1296_v38 = vmax.f32 %v1279_v60, 0.0  ;;  %v448_v45 = vrot.slane %v3019_v41, %v447_v3 }
 0x426   :  { %v1443_v20 = vpop.f32.mrf.mxu1  ;;  %v2724_v28 = vld [vmem:[#allocation5 + $0x140] sm:$0xff]  }
 0x427   :  { %2149 = vmatprep.mubr.bf16.mxu1 %v1553_v15  ;;  %v1539_v32 = vmul.f32 %v1443_v20, %v1284_v24  ;;  %v2719_v15 = vld [vmem:[#allocation5 + $0x1a0] sm:$0xff]  }
 0x428   :  { %v1445_v23 = vpop.f32.mrf.mxu1  ;;  %2150 = vmatmul.mubr.bf16.vlgmr.msra.gmra.mxu1 %v1552_v18  ;;  %v2721_v18 = vld [vmem:[#allocation5 + $0x1d8] sm:$0xff]  }
 0x429   :  { %2588 = vmatpush3.bf16.msra.mxu1 %v2699_v16  ;;  %v1546_v0 = vmul.f32 %v1445_v23, %v1291_v22  ;;  %v1234_v22 = vadd.f32 %v3022_v43, %v448_v45  ;;  %v455_v23 = vsub.s32 6, %v2976_v29  ;;  %v2726_v43 = vld [vmem:[#allocation5 + $0x100] sm:$0xff]  }
 0x42a   :  { %v1447_v2 = vpop.f32.mrf.mxu1  ;;  %2589 = vmatprep.subr.bf16.mxu1 %v2701_v21 }
 0x42b   :  { %v1547_v33 = vmul.f32 %v1447_v2, %v1292_v25  ;;  %v1554_v48 = vpack.c.bf16 %v1546_v0, %v1538_v34  ;;  %v2722_v25 = vld [vmem:[#allocation5 + $0x108] sm:$0xff]   ;;  %v2725_v0 = vld [vmem:[#allocation5 + $0x1d0] sm:$0xff]   ;;  %v1293_v2 = vmax.f32 %v1234_v22, 0.0 }
 0x42c   :  { %v3039_v35 = vpop.f32.mrf.mxu1 }
 0x42d   :  { %v1555_v44 = vpack.c.bf16 %v1547_v33, %v1539_v32  ;;  %2590 = vmatpush3.bf16.msra.mxu1 %v2703_v27  ;;  %v1230_v27 = vadd.f32 %v3007_v37, %v448_v45  ;;  %v2728_v37 = vld [vmem:[#allocation5 + $0x1c8] sm:$0xff]  }
 0x42e   :  { %v1486_v49 = vpop.f32.mrf.mxu1  ;;  %2591 = vmatprep.subr.bf16.mxu1 %v2704_v31  ;;  %v456_v31 = vrot.slane %v3019_v41, %v455_v23 }
 0x42f   :  { %2190 = vmatprep.mubr.bf16.mxu0 %v1555_v44  ;;  %v1541_v63 = vmul.f32 %v1486_v49, %v1286_v54  ;;  %v1285_v29 = vmax.f32 %v1230_v27, 0.0 }
 0x430   :  { %v3043_v53 = vpop.f32.mrf.mxu1  ;;  %2191 = vmatmul.mubr.bf16.vlgmr.msra.gmra.mxu0 %v1554_v48  ;;  %v1277_v32 = vadd.f32 %v3014_v40, %v456_v31  ;;  %v1273_v34 = vadd.f32 %v3005_v36, %v456_v31  ;;  %v2731_v40 = vld [vmem:[#allocation5 + $0x180] sm:$0xff]  }
 0x431   :  { %2592 = vmatpush3.bf16.msra.mxu1 %v2706_v46  ;;  %2610 = vmatpush3.bf16.msra.mxu0 %v2707_v47  ;;  %v1548_v33 = vmul.f32 %v3043_v53, %v1293_v2  ;;  %v1540_v39 = vmul.f32 %v3039_v35, %v1285_v29  ;;  %v2730_v46 = vld [vmem:[#allocation5 + $0x1c0] sm:$0xff]  }
 0x432   :  { %v1490_v57 = vpop.f32.mrf.mxu1  ;;  %2593 = vmatprep.subr.bf16.mxu1 %v2708_v51  ;;  %2611 = vmatprep.subr.bf16.mxu0 %v2709_v56  ;;  %v1295_v41 = vmax.f32 %v1277_v32, 0.0  ;;  %v1287_v47 = vmax.f32 %v1273_v34, 0.0 }
 0x433   :  { %v1549_v1 = vmul.f32 %v1490_v57, %v1294_v55  ;;  %v1556_v44 = vpack.c.bf16 %v1548_v33, %v1540_v39 }
 0x434   :  { %v3048_v4 = vpop.f32.mrf.mxu1 }
 0x435   :  { %v1557_v6 = vpack.c.bf16 %v1549_v1, %v1541_v63  ;;  %2594 = vmatpush3.bf16.msra.mxu1 %v2710_v19  ;;  %2612 = vmatpush3.bf16.msra.mxu0 %v2711_v5  ;;  %v1542_v49 = vmul.f32 %v3048_v4, %v1287_v47 }
 0x436   :  { %v1529_v9 = vpop.f32.mrf.mxu1  ;;  %2595 = vmatprep.subr.bf16.mxu1 %v2712_v58  ;;  %2613 = vmatprep.subr.bf16.mxu0 %v2713_v59 }
 0x437   :  { %2231 = vmatprep.mubr.bf16.mxu1 %v1557_v6  ;;  %v1543_v20 = vmul.f32 %v1529_v9, %v1288_v12 }
 0x438   :  { %v1531_v13 = vpop.f32.mrf.mxu1 }
 0x439   :  { %2596 = vmatpush3.bf16.msra.mxu1 %v2714_v7  ;;  %2614 = vmatpush3.bf16.msra.mxu0 %v2715_v8  ;;  %v1550_v48 = vmul.f32 %v1531_v13, %v1295_v41 }
 0x43a   :  { %v1533_v16 = vpop.f32.mrf.mxu1  ;;  %2597 = vmatprep.subr.bf16.mxu1 %v2716_v10  ;;  %2615 = vmatprep.subr.bf16.mxu0 %v2717_v11 }
 0x43b   :  { %v1551_v21 = vmul.f32 %v1533_v16, %v1296_v38  ;;  %v1558_v51 = vpack.c.bf16 %v1550_v48, %v1542_v49 }
 0x43d   :  { %v1559_v24 = vpack.c.bf16 %v1551_v21, %v1543_v20  ;;  %2598 = vmatpush3.bf16.msra.mxu1 %v2718_v14  ;;  %2616 = vmatpush3.bf16.msra.mxu0 %v2719_v15 }
 0x43e   :  { %2599 = vmatprep.subr.bf16.mxu1 %v2720_v17  ;;  %2617 = vmatprep.subr.bf16.mxu0 %v2721_v18 }
 0x43f   :  { %2272 = vmatprep.mubr.bf16.mxu0 %v1559_v24 }
 0x441   :  { %2600 = vmatpush3.bf16.msra.mxu1 %v2722_v25  ;;  %2618 = vmatpush3.bf16.msra.mxu0 %v2723_v26 }
 0x442   :  { %2601 = vmatprep.subr.bf16.mxu1 %v2724_v28  ;;  %2619 = vmatprep.subr.bf16.mxu0 %v2725_v0 }
 0x445   :  { %2602 = vmatpush3.bf16.msra.mxu1 %v2726_v43  ;;  %2620 = vmatpush3.bf16.msra.mxu0 %v2727_v30 }
 0x446   :  { %2621 = vmatprep.subr.bf16.mxu0 %v2728_v37 }
 0x448   :  { %2232 = vmatmul.mubr.bf16.vlgmr.msra.gmra.mxu1 %v1556_v44 }
 0x449   :  { %2622 = vmatpush3.bf16.msra.mxu0 %v2729_v42 }
 0x44a   :  { %2623 = vmatprep.subr.bf16.mxu0 %v2730_v46 }
 0x44d   :  { %2624 = vmatpush3.bf16.msra.mxu0 %v2731_v40 }
 0x450   :  { %2273 = vmatmul.mubr.bf16.vlgmr.msra.gmra.mxu0 %v1558_v51 }
 0x4e8   :  { %v2559_v36 = vpop.f32.mrf.mxu1 }
 0x4ea   :  { %v2560_v35 = vpop.f32.mrf.mxu1 }
 0x4eb   :  { %v2561_v57 = vadd.f32 %v2560_v35, %v2559_v36 }
 0x4ec   :  { %v2562_v56 = vpop.f32.mrf.mxu1 }
 0x4ed   :  { %v2152_v60 = vadd.f32 %v2561_v57, %v3029_v50 }
 0x4ee   :  { %v2563_v53 = vpop.f32.mrf.mxu1 }
 0x4ef   :  { %v2564_v63 = vadd.f32 %v2563_v53, %v2562_v56 }
 0x4f0   :  { %v2581_v52 = vpop.f32.mrf.mxu0 }
 0x4f1   :  { %v2155_v9 = vadd.f32 %v2564_v63, %v3033_v61 }
 0x4f2   :  { %v2582_v54 = vpop.f32.mrf.mxu0 }
 0x4f3   :  { %v2583_v59 = vadd.f32 %v2582_v54, %v2581_v52 }
 0x4f4   :  { %v2584_v19 = vpop.f32.mrf.mxu0 }
 0x4f5   :  { %v2193_v6 = vadd.f32 %v2583_v59, %v2152_v60 }
 0x4f6   :  { %v2585_v62 = vpop.f32.mrf.mxu0 }
 0x4f7   :  { %v2586_v7 = vadd.f32 %v2585_v62, %v2584_v19 }
 0x4f9   :  { %v2196_v45 = vadd.f32 %v2586_v7, %v2155_v9 }
 0x508   :  { %v2603_v55 = vpop.f32.mrf.mxu1 }
 0x50a   :  { %v2604_v5 = vpop.f32.mrf.mxu1 }
 0x50b   :  { %v2605_v1 = vadd.f32 %v2604_v5, %v2603_v55 }
 0x50c   :  { %v2606_v58 = vpop.f32.mrf.mxu1 }
 0x50d   :  { %v2234_v10 = vadd.f32 %v2605_v1, %v2193_v6 }
 0x50e   :  { %v2607_v3 = vpop.f32.mrf.mxu1 }
 0x50f   :  { %v2608_v11 = vadd.f32 %v2607_v3, %v2606_v58 }
 0x510   :  { %v2625_v4 = vpop.f32.mrf.mxu0 }
 0x511   :  { %v2237_v15 = vadd.f32 %v2608_v11, %v2196_v45 }
 0x512   :  { %v2626_v8 = vpop.f32.mrf.mxu0 }
 0x513   :  { %v2627_v12 = vadd.f32 %v2626_v8, %v2625_v4 }
 0x514   :  { %v2628_v38 = vpop.f32.mrf.mxu0 }
 0x515   :  { %v2275_v13 = vadd.f32 %v2627_v12, %v2234_v10 }
 0x516   :  { %v2629_v14 = vpop.f32.mrf.mxu0 }
 0x517   :  { %2281 = vst [vmem:[#allocation7] sm:$0xff] %v2275_v13  ;;  %v2630_v50 = vadd.f32 %v2629_v14, %v2628_v38 }
 0x519   :  { %v2278_v16 = vadd.f32 %v2630_v50, %v2237_v15 }
 0x51b   :  { %2282 = vst [vmem:[#allocation7 + $0x8] sm:$0xff] %v2278_v16 }
 0x51c   :  { %2795 = shalt.err (!%p2792_p0)
}
 0x51d   :  { %s2821_s17 = smov 128   ;;  %s2822_s18 = smov 8  }
 0x51e   :  { %2294 = dma.vmem_to_hbm [thread:$0]  %s2289_s15, 256, %s3073_s8, [#allocation4], %s2821_s17, %s2821_s17, %s2822_s18  }
 0x51f   :  { %2808 = dma.done.wait [#allocation4], 256  }
 0x520   :  { %2809 = vsyncadd [#allocation4], 4294967040 }
 0x521   :  { %2298 = vsyncpa [#allocation3], 1 }
 0x522   :  { %2299 = vsyncpa [#allocation6], 1 }
 0x523   :  { %2300 = vsyncpa [#allocation4], 1 }

</bundles_post_ra>
